<compile_context>
chip_gen: v7x
topology: tpu7x:2x2x1
jax: 0.10.0
libtpu: 0.0.40
codegen_flags: <defaults>
</compile_context>

<pallas_src>
import functools
import math

import jax
import jax.numpy as jnp
from jax import lax
from jax.experimental import pallas as pl
from jax.experimental.pallas import tpu as pltpu

_LANE = 128


# ------------------------------- fused kernel --------------------------------


def _gnn_stack_kernel(x_ref, ea_ref, src_ref, dst_ref,
                      wm_ref, bm_ref, wa_ref, ba_ref, we_ref, be_ref,
                      out_ref, *, num_layers, normalize):
    N = x_ref.shape[0]
    E = ea_ref.shape[0]
    CP = x_ref.shape[1]
    shift = CP // 2                                        # direction-agnostic lane roll
    f32 = jnp.float32
    bf16 = jnp.bfloat16

    # ---- hoisted (edge_index-only) work: built once, reused by every layer ----
    src = src_ref[...]                                     # [E, 1] int32
    dst = dst_ref[...]                                     # [E, 1] int32
    lane_node = lax.broadcasted_iota(jnp.int32, (E, N), 1)

    # 0/1 one-hot operators are exact in bf16 -> native bf16 MXU path, half the VMEM.
    gsrc_f32 = (src == lane_node).astype(f32)              # [E, N]
    gdst_f32 = (dst == lane_node).astype(f32)              # [E, N]
    gather_src = gsrc_f32.astype(bf16)                     # x[src] = gather_src @ x
    gather_dst = gdst_f32.astype(bf16)                     # x[dst]; also reused (contracted
    #                                                        over its edge axis) as the scatter.

    # mean divisor folded per edge: 1/deg[dst_e] (isolated nodes never appear as dst)
    deg_row = jnp.sum(gdst_f32, axis=0, keepdims=True)             # [1, N] in-degree
    inv_deg_row = pl.reciprocal(jnp.maximum(deg_row, 1.0), approx=True)
    inv_deg_edge = jnp.sum(gdst_f32 * inv_deg_row, axis=1, keepdims=True)   # [E, 1]

    x = x_ref[...]                                         # [N, CP] f32, data in lanes [0, C)
    ea = ea_ref[...]                                       # [E, CP] f32, data in lanes [C, C+Ce)

    # x[edge_index[0]] gather (hoisted; refreshed per layer only in the edge-update branch)
    x_src = jnp.dot(gather_src, x.astype(bf16), preferred_element_type=f32)   # [E, CP]

    for l in range(num_layers):
        # message: relu(message_lin(cat(x_j, edge_attr)))
        # concat realized by lane packing (x_src in [0,C), ea in [C,C+Ce)) -> ONE fused matmul.
        m = (jnp.dot((x_src + ea).astype(bf16), wm_ref[l],
                     preferred_element_type=f32) + bm_ref[l])
        m = jnp.maximum(m, 0.0)                                               # [E, CP]

        # scatter-mean over destination nodes: pre-scale by 1/deg[dst], then contract
        # gather_dst over its edge axis (transposed scatter, no [N,E] buffer).
        agg = lax.dot_general(gather_dst, (m * inv_deg_edge).astype(bf16),
                              (((0,), (0,)), ((), ())),
                              preferred_element_type=f32)                     # [N, CP]

        # update: relu(agg_lin(cat(aggr_out, x))); x lane-rolled to [CP/2, CP/2+C) -> ONE matmul.
        h_in = agg + pltpu.roll(x, shift, 1)
        h = (jnp.dot(h_in.astype(bf16), wa_ref[l],
                     preferred_element_type=f32) + ba_ref[l])
        h = jnp.maximum(h, 0.0)
        if normalize:   # F.normalize(h, p=2, dim=-1); rsqrt goes to the EUP slot
            ssq = jnp.sum(h * h, axis=-1, keepdims=True)
            h = h * lax.rsqrt(jnp.maximum(ssq, 1e-24))
        x = h

        if l < num_layers - 1:
            # TODO(synk): F.dropout(training=True) is stochastic; eval-mode identity here.
            # edge update: relu(edge_mlp(cat(x[edge_index[0]], x[edge_index[1]], edge_attr)))
            # x_i in [0,C), x_j rolled to [CP/2, CP/2+C), ea in [C,C+Ce) -> ONE fused matmul.
            x_bf = x.astype(bf16)
            x_src = jnp.dot(gather_src, x_bf, preferred_element_type=f32)     # reused next layer
            x_dst = jnp.dot(gather_dst, x_bf, preferred_element_type=f32)
            e_in = x_src + pltpu.roll(x_dst, shift, 1) + ea
            ea = (jnp.dot(e_in.astype(bf16), we_ref[l],
                          preferred_element_type=f32) + be_ref[l])
            ea = jnp.maximum(ea, 0.0)                       # new ea stays packed at [C, C+Ce)

    out_ref[...] = x


# -------------------------------- wrapper -------------------------------------


def _vmem_spec():
    return pl.BlockSpec(memory_space=pltpu.MemorySpace.VMEM)


def _vmem_limit_bytes(N, E, CP, L):
    onehot = 2 * E * N * (2 + 4)            # bf16 gather/scatter + transient f32 build
    edges = 6 * E * CP * 4                  # ea, x_src, x_dst, m, packed operands (f32)
    nodes = 5 * N * CP * 4                  # x (aliased in/out), agg, h, h_in
    weights = 3 * max(L, 1) * CP * CP * 2 + 3 * max(L, 1) * CP * 4
    total = int((onehot + edges + nodes + weights) * 1.5) + (4 << 20)
    # raise above the 16/32 MiB scoped defaults but stay well under v7x's 64 MiB VMEM
    return min(max(total, 32 << 20), 48 << 20)


@functools.partial(jax.jit, static_argnames=("num_layers", "normalize_embs"))
def gnn_stack_forward(x, edge_attr, edge_index, params, *, num_layers, normalize_embs):
    N, C = x.shape
    E, Ce = edge_attr.shape
    CP = params["wm"].shape[-1]             # lane-padded channel width (128)
    off_e = C                               # edge_attr lane offset (matches init packing)

    # lane packing of the feature arrays (zero lanes stay zero through all layers)
    x_p = jnp.pad(x.astype(jnp.float32), ((0, 0), (0, CP - C)))
    ea_p = jnp.pad(edge_attr.astype(jnp.float32), ((0, 0), (off_e, CP - off_e - Ce)))

    src = edge_index[0].reshape(E, 1).astype(jnp.int32)
    dst = edge_index[1].reshape(E, 1).astype(jnp.int32)

    kern = functools.partial(_gnn_stack_kernel,
                             num_layers=num_layers, normalize=normalize_embs)

    # advisory cost hint for the XLA scheduler
    L = num_layers
    flops = (2 * E * N * CP * (3 * L - 1)           # src/dst gathers + dst scatter
             + 2 * E * CP * CP * (2 * L - 1)        # fused message + edge matmuls
             + 2 * N * CP * CP * L)                 # fused update matmuls
    w_bytes = sum(int(params[k].size) * params[k].dtype.itemsize for k in params)
    cost = pl.CostEstimate(
        flops=flops,
        transcendentals=(L * N if normalize_embs else 0) + N,
        bytes_accessed=4 * (2 * N * CP + E * CP + 2 * E) + w_bytes)

    out = pl.pallas_call(
        kern,
        out_shape=jax.ShapeDtypeStruct((N, CP), jnp.float32),
        in_specs=[_vmem_spec() for _ in range(10)],
        out_specs=_vmem_spec(),
        input_output_aliases={0: 0},        # reuse the padded-x buffer for the output
        cost_estimate=cost,
        compiler_params=pltpu.CompilerParams(
            vmem_limit_bytes=_vmem_limit_bytes(N, E, CP, L)),
    )(x_p, ea_p, src, dst,
      params["wm"], params["bm"], params["wa"], params["ba"],
      params["we"], params["be"])

    return out[:, :C]


# --------------------------- parameter init -----------------------------------


def _linear_params(key, fan_in, fan_out):
    # PyTorch nn.Linear default: U(-1/sqrt(fan_in), 1/sqrt(fan_in)) for W and b.
    kw, kb = jax.random.split(key)
    bound = 1.0 / math.sqrt(fan_in)
    w = jax.random.uniform(kw, (fan_in, fan_out), jnp.float32, -bound, bound)
    b = jax.random.uniform(kb, (1, fan_out), jnp.float32, -bound, bound)
    return w, b


def init_gnn_stack_params(key, node_channels, edge_channels, num_layers):
    C, Ce = node_channels, edge_channels
    CP = _LANE
    half = CP // 2
    if C > half or C + Ce > half:
        # TODO(synk): lane-packed fused-concat weights need C <= 64 and C+Ce <= 64;
        #             wider channels require falling back to split matmuls.
        raise NotImplementedError("channel widths too large for lane-packed fusion")
    off_e = C                                   # edge_attr lane offset

    n_keys = 2 * num_layers + max(num_layers - 1, 0)
    keys = jax.random.split(key, max(n_keys, 1))
    k = 0

    def place(blocks, out_cols):
        w = jnp.zeros((CP, CP), jnp.float32)
        for (r0, r1), blk in blocks:
            w = w.at[r0:r1, out_cols[0]:out_cols[1]].set(blk)
        return w.astype(jnp.bfloat16)           # weights live in bf16 (MXU operands)

    def place_bias(b, out_cols):
        v = jnp.zeros((1, CP), jnp.float32)
        return v.at[:, out_cols[0]:out_cols[1]].set(b)

    wm_l, bm_l, wa_l, ba_l = [], [], [], []
    for _ in range(num_layers):
        wm, bmv = _linear_params(keys[k], C + Ce, C); k += 1        # message_lin
        wa, bav = _linear_params(keys[k], C + C, C); k += 1         # agg_lin
        # message: x_j rows at [0,C), edge rows at [C,C+Ce); output cols [0,C)
        wm_l.append(place([((0, C), wm[:C]), ((off_e, off_e + Ce), wm[C:])], (0, C)))
        bm_l.append(place_bias(bmv, (0, C)))
        # update: aggr rows at [0,C), x rows at [CP/2, CP/2+C); output cols [0,C)
        wa_l.append(place([((0, C), wa[:C]), ((half, half + C), wa[C:])], (0, C)))
        ba_l.append(place_bias(bav, (0, C)))

    we_l, be_l = [], []
    for _ in range(num_layers - 1):
        we, bev = _linear_params(keys[k], 2 * C + Ce, Ce); k += 1   # edge_update_mlp
        # x_i rows [0,C), x_j rows [CP/2, CP/2+C), edge rows [C,C+Ce); output cols [C,C+Ce)
        we_l.append(place([((0, C), we[:C]),
                           ((half, half + C), we[C:2 * C]),
                           ((off_e, off_e + Ce), we[2 * C:])], (off_e, off_e + Ce)))
        be_l.append(place_bias(bev, (off_e, off_e + Ce)))
    if not we_l:    # keep the stacked arrays non-empty (unused in-kernel for L == 1)
        we_l.append(jnp.zeros((CP, CP), jnp.bfloat16))
        be_l.append(jnp.zeros((1, CP), jnp.float32))

    return dict(wm=jnp.stack(wm_l), bm=jnp.stack(bm_l),
                wa=jnp.stack(wa_l), ba=jnp.stack(ba_l),
                we=jnp.stack(we_l), be=jnp.stack(be_l))


# ---------------------------------- main ---------------------------------------


if __name__ == "__main__":
    node_channels = 32
    edge_channels = 16
    num_layers = 3
    normalize_embs = True
    N, E = 16, 48

    root = jax.random.PRNGKey(0)
    k_x, k_e, k_src, k_dst, k_p = jax.random.split(root, 5)

    x = jax.random.normal(k_x, (N, node_channels), jnp.float32)
    edge_attr = jax.random.normal(k_e, (E, edge_channels), jnp.float32)
    edge_index = jnp.stack([
        jax.random.randint(k_src, (E,), 0, N, jnp.int32),
        jax.random.randint(k_dst, (E,), 0, N, jnp.int32),
    ], axis=0)

    params = init_gnn_stack_params(k_p, node_channels, edge_channels, num_layers)

    out = gnn_stack_forward(x, edge_attr, edge_index, params,
                            num_layers=num_layers, normalize_embs=normalize_embs)
    jax.block_until_ready(out)
    assert out.shape == (N, node_channels) and out.dtype == jnp.float32
    assert bool(jnp.all(jnp.isfinite(out)))
    print("KERNEL_OK")
</pallas_src>

<mosaic_0001>
module attributes {stable_mosaic.version = 11 : i64} {
  func.func @_gnn_stack_kernel(%arg0: memref<16x128xf32, #tpu.memory_space<vmem>>, %arg1: memref<48x128xf32, #tpu.memory_space<vmem>>, %arg2: memref<48x1xi32, #tpu.memory_space<vmem>>, %arg3: memref<48x1xi32, #tpu.memory_space<vmem>>, %arg4: memref<3x128x128xbf16, #tpu.memory_space<vmem>>, %arg5: memref<3x1x128xf32, #tpu.memory_space<vmem>>, %arg6: memref<3x128x128xbf16, #tpu.memory_space<vmem>>, %arg7: memref<3x1x128xf32, #tpu.memory_space<vmem>>, %arg8: memref<2x128x128xbf16, #tpu.memory_space<vmem>>, %arg9: memref<2x1x128xf32, #tpu.memory_space<vmem>>, %arg10: memref<16x128xf32, #tpu.memory_space<vmem>>) attributes {dimension_semantics = [], scalar_prefetch = 0 : i64, scratch_operands = 0 : i64, tpu.core_type = #tpu.core_type<tc>} {
    %c0 = arith.constant 0 : index
    %c0_0 = arith.constant 0 : index
    %0 = vector.load %arg2[%c0, %c0_0] : memref<48x1xi32, #tpu.memory_space<vmem>>, vector<48x1xi32>
    %c0_1 = arith.constant 0 : index
    %c0_2 = arith.constant 0 : index
    %1 = vector.load %arg3[%c0_1, %c0_2] : memref<48x1xi32, #tpu.memory_space<vmem>>, vector<48x1xi32>
    %2 = tpu.iota {dimensions = array<i32: 1>} : vector<48x16xi32>
    %3 = vector.broadcast %0 : vector<48x1xi32> to vector<48x16xi32>
    %4 = arith.cmpi eq, %3, %2 : vector<48x16xi32>
    %5 = arith.extui %4 : vector<48x16xi1> to vector<48x16xi32>
    %6 = arith.sitofp %5 : vector<48x16xi32> to vector<48x16xf32>
    %7 = vector.broadcast %1 : vector<48x1xi32> to vector<48x16xi32>
    %8 = arith.cmpi eq, %7, %2 : vector<48x16xi32>
    %9 = arith.extui %8 : vector<48x16xi1> to vector<48x16xi32>
    %10 = arith.sitofp %9 : vector<48x16xi32> to vector<48x16xf32>
    %11 = arith.truncf %6 : vector<48x16xf32> to vector<48x16xbf16>
    %12 = arith.truncf %10 : vector<48x16xf32> to vector<48x16xbf16>
    %cst = arith.constant dense<0.000000e+00> : vector<16xf32>
    %13 = vector.multi_reduction <add>, %10, %cst [0] : vector<48x16xf32> to vector<16xf32>
    %14 = vector.shape_cast %13 : vector<16xf32> to vector<1x16xf32>
    %cst_3 = arith.constant 1.000000e+00 : f32
    %15 = vector.broadcast %cst_3 : f32 to vector<1x16xf32>
    %16 = arith.maximumf %14, %15 : vector<1x16xf32>
    %17 = tpu.reciprocal %16 {approx = true} : vector<1x16xf32> -> vector<1x16xf32>
    %18 = vector.broadcast %17 : vector<1x16xf32> to vector<48x16xf32>
    %19 = arith.mulf %10, %18 : vector<48x16xf32>
    %cst_4 = arith.constant dense<0.000000e+00> : vector<48xf32>
    %20 = vector.multi_reduction <add>, %19, %cst_4 [1] : vector<48x16xf32> to vector<48xf32>
    %21 = vector.shape_cast %20 : vector<48xf32> to vector<48x1xf32>
    %c0_5 = arith.constant 0 : index
    %c0_6 = arith.constant 0 : index
    %22 = vector.load %arg0[%c0_5, %c0_6] : memref<16x128xf32, #tpu.memory_space<vmem>>, vector<16x128xf32>
    %c0_7 = arith.constant 0 : index
    %c0_8 = arith.constant 0 : index
    %23 = vector.load %arg1[%c0_7, %c0_8] : memref<48x128xf32, #tpu.memory_space<vmem>>, vector<48x128xf32>
    %24 = arith.truncf %22 : vector<16x128xf32> to vector<16x128xbf16>
    %cst_9 = arith.constant dense<0.000000e+00> : vector<48x128xf32>
    %25 = tpu.matmul %11, %24, %cst_9 {dimension_numbers = #tpu.dot_dimension_numbers<[1], [0], [0], [1], [0, 0, 1, 1], [], []>} : vector<48x16xbf16>, vector<16x128xbf16>, vector<48x128xf32> -> vector<48x128xf32>
    %26 = arith.addf %25, %23 : vector<48x128xf32>
    %27 = arith.truncf %26 : vector<48x128xf32> to vector<48x128xbf16>
    %c0_10 = arith.constant 0 : index
    %c0_11 = arith.constant 0 : index
    %c0_12 = arith.constant 0 : index
    %28 = vector.load %arg4[%c0_10, %c0_11, %c0_12] : memref<3x128x128xbf16, #tpu.memory_space<vmem>>, vector<1x128x128xbf16>
    %29 = vector.shape_cast %28 : vector<1x128x128xbf16> to vector<128x128xbf16>
    %cst_13 = arith.constant dense<0.000000e+00> : vector<48x128xf32>
    %30 = tpu.matmul %27, %29, %cst_13 {dimension_numbers = #tpu.dot_dimension_numbers<[1], [0], [0], [1], [0, 0, 1, 1], [], []>} : vector<48x128xbf16>, vector<128x128xbf16>, vector<48x128xf32> -> vector<48x128xf32>
    %c0_14 = arith.constant 0 : index
    %c0_15 = arith.constant 0 : index
    %c0_16 = arith.constant 0 : index
    %31 = vector.load %arg5[%c0_14, %c0_15, %c0_16] : memref<3x1x128xf32, #tpu.memory_space<vmem>>, vector<1x1x128xf32>
    %32 = vector.shape_cast %31 : vector<1x1x128xf32> to vector<1x128xf32>
    %33 = vector.broadcast %32 : vector<1x128xf32> to vector<48x128xf32>
    %34 = arith.addf %30, %33 : vector<48x128xf32>
    %cst_17 = arith.constant 0.000000e+00 : f32
    %35 = vector.broadcast %cst_17 : f32 to vector<48x128xf32>
    %36 = arith.maximumf %34, %35 : vector<48x128xf32>
    %37 = vector.broadcast %21 : vector<48x1xf32> to vector<48x128xf32>
    %38 = arith.mulf %36, %37 : vector<48x128xf32>
    %39 = arith.truncf %38 : vector<48x128xf32> to vector<48x128xbf16>
    %cst_18 = arith.constant dense<0.000000e+00> : vector<16x128xf32>
    %40 = tpu.matmul %12, %39, %cst_18 {dimension_numbers = #tpu.dot_dimension_numbers<[0], [0], [1], [1], [0, 1, 1, 1], [], []>} : vector<48x16xbf16>, vector<48x128xbf16>, vector<16x128xf32> -> vector<16x128xf32>
    %c64_i32 = arith.constant 64 : i32
    %41 = tpu.dynamic_rotate %22 by %c64_i32 dim 1 : vector<16x128xf32>, i32 -> vector<16x128xf32>
    %42 = arith.addf %40, %41 : vector<16x128xf32>
    %43 = arith.truncf %42 : vector<16x128xf32> to vector<16x128xbf16>
    %c0_19 = arith.constant 0 : index
    %c0_20 = arith.constant 0 : index
    %c0_21 = arith.constant 0 : index
    %44 = vector.load %arg6[%c0_19, %c0_20, %c0_21] : memref<3x128x128xbf16, #tpu.memory_space<vmem>>, vector<1x128x128xbf16>
    %45 = vector.shape_cast %44 : vector<1x128x128xbf16> to vector<128x128xbf16>
    %cst_22 = arith.constant dense<0.000000e+00> : vector<16x128xf32>
    %46 = tpu.matmul %43, %45, %cst_22 {dimension_numbers = #tpu.dot_dimension_numbers<[1], [0], [0], [1], [0, 0, 1, 1], [], []>} : vector<16x128xbf16>, vector<128x128xbf16>, vector<16x128xf32> -> vector<16x128xf32>
    %c0_23 = arith.constant 0 : index
    %c0_24 = arith.constant 0 : index
    %c0_25 = arith.constant 0 : index
    %47 = vector.load %arg7[%c0_23, %c0_24, %c0_25] : memref<3x1x128xf32, #tpu.memory_space<vmem>>, vector<1x1x128xf32>
    %48 = vector.shape_cast %47 : vector<1x1x128xf32> to vector<1x128xf32>
    %49 = vector.broadcast %48 : vector<1x128xf32> to vector<16x128xf32>
    %50 = arith.addf %46, %49 : vector<16x128xf32>
    %cst_26 = arith.constant 0.000000e+00 : f32
    %51 = vector.broadcast %cst_26 : f32 to vector<16x128xf32>
    %52 = arith.maximumf %50, %51 : vector<16x128xf32>
    %53 = arith.mulf %52, %52 : vector<16x128xf32>
    %cst_27 = arith.constant dense<0.000000e+00> : vector<16xf32>
    %54 = vector.multi_reduction <add>, %53, %cst_27 [1] : vector<16x128xf32> to vector<16xf32>
    %55 = vector.shape_cast %54 : vector<16xf32> to vector<16x1xf32>
    %cst_28 = arith.constant 1.000000e-24 : f32
    %56 = vector.broadcast %cst_28 : f32 to vector<16x1xf32>
    %57 = arith.maximumf %55, %56 : vector<16x1xf32>
    %58 = math.rsqrt %57 : vector<16x1xf32>
    %59 = vector.broadcast %58 : vector<16x1xf32> to vector<16x128xf32>
    %60 = arith.mulf %52, %59 : vector<16x128xf32>
    %61 = arith.truncf %60 : vector<16x128xf32> to vector<16x128xbf16>
    %cst_29 = arith.constant dense<0.000000e+00> : vector<48x128xf32>
    %62 = tpu.matmul %11, %61, %cst_29 {dimension_numbers = #tpu.dot_dimension_numbers<[1], [0], [0], [1], [0, 0, 1, 1], [], []>} : vector<48x16xbf16>, vector<16x128xbf16>, vector<48x128xf32> -> vector<48x128xf32>
    %cst_30 = arith.constant dense<0.000000e+00> : vector<48x128xf32>
    %63 = tpu.matmul %12, %61, %cst_30 {dimension_numbers = #tpu.dot_dimension_numbers<[1], [0], [0], [1], [0, 0, 1, 1], [], []>} : vector<48x16xbf16>, vector<16x128xbf16>, vector<48x128xf32> -> vector<48x128xf32>
    %c64_i32_31 = arith.constant 64 : i32
    %64 = tpu.dynamic_rotate %63 by %c64_i32_31 dim 1 : vector<48x128xf32>, i32 -> vector<48x128xf32>
    %65 = arith.addf %62, %64 : vector<48x128xf32>
    %66 = arith.addf %65, %23 : vector<48x128xf32>
    %67 = arith.truncf %66 : vector<48x128xf32> to vector<48x128xbf16>
    %c0_32 = arith.constant 0 : index
    %c0_33 = arith.constant 0 : index
    %c0_34 = arith.constant 0 : index
    %68 = vector.load %arg8[%c0_32, %c0_33, %c0_34] : memref<2x128x128xbf16, #tpu.memory_space<vmem>>, vector<1x128x128xbf16>
    %69 = vector.shape_cast %68 : vector<1x128x128xbf16> to vector<128x128xbf16>
    %cst_35 = arith.constant dense<0.000000e+00> : vector<48x128xf32>
    %70 = tpu.matmul %67, %69, %cst_35 {dimension_numbers = #tpu.dot_dimension_numbers<[1], [0], [0], [1], [0, 0, 1, 1], [], []>} : vector<48x128xbf16>, vector<128x128xbf16>, vector<48x128xf32> -> vector<48x128xf32>
    %c0_36 = arith.constant 0 : index
    %c0_37 = arith.constant 0 : index
    %c0_38 = arith.constant 0 : index
    %71 = vector.load %arg9[%c0_36, %c0_37, %c0_38] : memref<2x1x128xf32, #tpu.memory_space<vmem>>, vector<1x1x128xf32>
    %72 = vector.shape_cast %71 : vector<1x1x128xf32> to vector<1x128xf32>
    %73 = vector.broadcast %72 : vector<1x128xf32> to vector<48x128xf32>
    %74 = arith.addf %70, %73 : vector<48x128xf32>
    %cst_39 = arith.constant 0.000000e+00 : f32
    %75 = vector.broadcast %cst_39 : f32 to vector<48x128xf32>
    %76 = arith.maximumf %74, %75 : vector<48x128xf32>
    %77 = arith.addf %62, %76 : vector<48x128xf32>
    %78 = arith.truncf %77 : vector<48x128xf32> to vector<48x128xbf16>
    %c1 = arith.constant 1 : index
    %c0_40 = arith.constant 0 : index
    %c0_41 = arith.constant 0 : index
    %79 = vector.load %arg4[%c1, %c0_40, %c0_41] : memref<3x128x128xbf16, #tpu.memory_space<vmem>>, vector<1x128x128xbf16>
    %80 = vector.shape_cast %79 : vector<1x128x128xbf16> to vector<128x128xbf16>
    %cst_42 = arith.constant dense<0.000000e+00> : vector<48x128xf32>
    %81 = tpu.matmul %78, %80, %cst_42 {dimension_numbers = #tpu.dot_dimension_numbers<[1], [0], [0], [1], [0, 0, 1, 1], [], []>} : vector<48x128xbf16>, vector<128x128xbf16>, vector<48x128xf32> -> vector<48x128xf32>
    %c1_43 = arith.constant 1 : index
    %c0_44 = arith.constant 0 : index
    %c0_45 = arith.constant 0 : index
    %82 = vector.load %arg5[%c1_43, %c0_44, %c0_45] : memref<3x1x128xf32, #tpu.memory_space<vmem>>, vector<1x1x128xf32>
    %83 = vector.shape_cast %82 : vector<1x1x128xf32> to vector<1x128xf32>
    %84 = vector.broadcast %83 : vector<1x128xf32> to vector<48x128xf32>
    %85 = arith.addf %81, %84 : vector<48x128xf32>
    %cst_46 = arith.constant 0.000000e+00 : f32
    %86 = vector.broadcast %cst_46 : f32 to vector<48x128xf32>
    %87 = arith.maximumf %85, %86 : vector<48x128xf32>
    %88 = vector.broadcast %21 : vector<48x1xf32> to vector<48x128xf32>
    %89 = arith.mulf %87, %88 : vector<48x128xf32>
    %90 = arith.truncf %89 : vector<48x128xf32> to vector<48x128xbf16>
    %cst_47 = arith.constant dense<0.000000e+00> : vector<16x128xf32>
    %91 = tpu.matmul %12, %90, %cst_47 {dimension_numbers = #tpu.dot_dimension_numbers<[0], [0], [1], [1], [0, 1, 1, 1], [], []>} : vector<48x16xbf16>, vector<48x128xbf16>, vector<16x128xf32> -> vector<16x128xf32>
    %c64_i32_48 = arith.constant 64 : i32
    %92 = tpu.dynamic_rotate %60 by %c64_i32_48 dim 1 : vector<16x128xf32>, i32 -> vector<16x128xf32>
    %93 = arith.addf %91, %92 : vector<16x128xf32>
    %94 = arith.truncf %93 : vector<16x128xf32> to vector<16x128xbf16>
    %c1_49 = arith.constant 1 : index
    %c0_50 = arith.constant 0 : index
    %c0_51 = arith.constant 0 : index
    %95 = vector.load %arg6[%c1_49, %c0_50, %c0_51] : memref<3x128x128xbf16, #tpu.memory_space<vmem>>, vector<1x128x128xbf16>
    %96 = vector.shape_cast %95 : vector<1x128x128xbf16> to vector<128x128xbf16>
    %cst_52 = arith.constant dense<0.000000e+00> : vector<16x128xf32>
    %97 = tpu.matmul %94, %96, %cst_52 {dimension_numbers = #tpu.dot_dimension_numbers<[1], [0], [0], [1], [0, 0, 1, 1], [], []>} : vector<16x128xbf16>, vector<128x128xbf16>, vector<16x128xf32> -> vector<16x128xf32>
    %c1_53 = arith.constant 1 : index
    %c0_54 = arith.constant 0 : index
    %c0_55 = arith.constant 0 : index
    %98 = vector.load %arg7[%c1_53, %c0_54, %c0_55] : memref<3x1x128xf32, #tpu.memory_space<vmem>>, vector<1x1x128xf32>
    %99 = vector.shape_cast %98 : vector<1x1x128xf32> to vector<1x128xf32>
    %100 = vector.broadcast %99 : vector<1x128xf32> to vector<16x128xf32>
    %101 = arith.addf %97, %100 : vector<16x128xf32>
    %cst_56 = arith.constant 0.000000e+00 : f32
    %102 = vector.broadcast %cst_56 : f32 to vector<16x128xf32>
    %103 = arith.maximumf %101, %102 : vector<16x128xf32>
    %104 = arith.mulf %103, %103 : vector<16x128xf32>
    %cst_57 = arith.constant dense<0.000000e+00> : vector<16xf32>
    %105 = vector.multi_reduction <add>, %104, %cst_57 [1] : vector<16x128xf32> to vector<16xf32>
    %106 = vector.shape_cast %105 : vector<16xf32> to vector<16x1xf32>
    %cst_58 = arith.constant 1.000000e-24 : f32
    %107 = vector.broadcast %cst_58 : f32 to vector<16x1xf32>
    %108 = arith.maximumf %106, %107 : vector<16x1xf32>
    %109 = math.rsqrt %108 : vector<16x1xf32>
    %110 = vector.broadcast %109 : vector<16x1xf32> to vector<16x128xf32>
    %111 = arith.mulf %103, %110 : vector<16x128xf32>
    %112 = arith.truncf %111 : vector<16x128xf32> to vector<16x128xbf16>
    %cst_59 = arith.constant dense<0.000000e+00> : vector<48x128xf32>
    %113 = tpu.matmul %11, %112, %cst_59 {dimension_numbers = #tpu.dot_dimension_numbers<[1], [0], [0], [1], [0, 0, 1, 1], [], []>} : vector<48x16xbf16>, vector<16x128xbf16>, vector<48x128xf32> -> vector<48x128xf32>
    %cst_60 = arith.constant dense<0.000000e+00> : vector<48x128xf32>
    %114 = tpu.matmul %12, %112, %cst_60 {dimension_numbers = #tpu.dot_dimension_numbers<[1], [0], [0], [1], [0, 0, 1, 1], [], []>} : vector<48x16xbf16>, vector<16x128xbf16>, vector<48x128xf32> -> vector<48x128xf32>
    %c64_i32_61 = arith.constant 64 : i32
    %115 = tpu.dynamic_rotate %114 by %c64_i32_61 dim 1 : vector<48x128xf32>, i32 -> vector<48x128xf32>
    %116 = arith.addf %113, %115 : vector<48x128xf32>
    %117 = arith.addf %116, %76 : vector<48x128xf32>
    %118 = arith.truncf %117 : vector<48x128xf32> to vector<48x128xbf16>
    %c1_62 = arith.constant 1 : index
    %c0_63 = arith.constant 0 : index
    %c0_64 = arith.constant 0 : index
    %119 = vector.load %arg8[%c1_62, %c0_63, %c0_64] : memref<2x128x128xbf16, #tpu.memory_space<vmem>>, vector<1x128x128xbf16>
    %120 = vector.shape_cast %119 : vector<1x128x128xbf16> to vector<128x128xbf16>
    %cst_65 = arith.constant dense<0.000000e+00> : vector<48x128xf32>
    %121 = tpu.matmul %118, %120, %cst_65 {dimension_numbers = #tpu.dot_dimension_numbers<[1], [0], [0], [1], [0, 0, 1, 1], [], []>} : vector<48x128xbf16>, vector<128x128xbf16>, vector<48x128xf32> -> vector<48x128xf32>
    %c1_66 = arith.constant 1 : index
    %c0_67 = arith.constant 0 : index
    %c0_68 = arith.constant 0 : index
    %122 = vector.load %arg9[%c1_66, %c0_67, %c0_68] : memref<2x1x128xf32, #tpu.memory_space<vmem>>, vector<1x1x128xf32>
    %123 = vector.shape_cast %122 : vector<1x1x128xf32> to vector<1x128xf32>
    %124 = vector.broadcast %123 : vector<1x128xf32> to vector<48x128xf32>
    %125 = arith.addf %121, %124 : vector<48x128xf32>
    %cst_69 = arith.constant 0.000000e+00 : f32
    %126 = vector.broadcast %cst_69 : f32 to vector<48x128xf32>
    %127 = arith.maximumf %125, %126 : vector<48x128xf32>
    %128 = arith.addf %113, %127 : vector<48x128xf32>
    %129 = arith.truncf %128 : vector<48x128xf32> to vector<48x128xbf16>
    %c2 = arith.constant 2 : index
    %c0_70 = arith.constant 0 : index
    %c0_71 = arith.constant 0 : index
    %130 = vector.load %arg4[%c2, %c0_70, %c0_71] : memref<3x128x128xbf16, #tpu.memory_space<vmem>>, vector<1x128x128xbf16>
    %131 = vector.shape_cast %130 : vector<1x128x128xbf16> to vector<128x128xbf16>
    %cst_72 = arith.constant dense<0.000000e+00> : vector<48x128xf32>
    %132 = tpu.matmul %129, %131, %cst_72 {dimension_numbers = #tpu.dot_dimension_numbers<[1], [0], [0], [1], [0, 0, 1, 1], [], []>} : vector<48x128xbf16>, vector<128x128xbf16>, vector<48x128xf32> -> vector<48x128xf32>
    %c2_73 = arith.constant 2 : index
    %c0_74 = arith.constant 0 : index
    %c0_75 = arith.constant 0 : index
    %133 = vector.load %arg5[%c2_73, %c0_74, %c0_75] : memref<3x1x128xf32, #tpu.memory_space<vmem>>, vector<1x1x128xf32>
    %134 = vector.shape_cast %133 : vector<1x1x128xf32> to vector<1x128xf32>
    %135 = vector.broadcast %134 : vector<1x128xf32> to vector<48x128xf32>
    %136 = arith.addf %132, %135 : vector<48x128xf32>
    %cst_76 = arith.constant 0.000000e+00 : f32
    %137 = vector.broadcast %cst_76 : f32 to vector<48x128xf32>
    %138 = arith.maximumf %136, %137 : vector<48x128xf32>
    %139 = vector.broadcast %21 : vector<48x1xf32> to vector<48x128xf32>
    %140 = arith.mulf %138, %139 : vector<48x128xf32>
    %141 = arith.truncf %140 : vector<48x128xf32> to vector<48x128xbf16>
    %cst_77 = arith.constant dense<0.000000e+00> : vector<16x128xf32>
    %142 = tpu.matmul %12, %141, %cst_77 {dimension_numbers = #tpu.dot_dimension_numbers<[0], [0], [1], [1], [0, 1, 1, 1], [], []>} : vector<48x16xbf16>, vector<48x128xbf16>, vector<16x128xf32> -> vector<16x128xf32>
    %c64_i32_78 = arith.constant 64 : i32
    %143 = tpu.dynamic_rotate %111 by %c64_i32_78 dim 1 : vector<16x128xf32>, i32 -> vector<16x128xf32>
    %144 = arith.addf %142, %143 : vector<16x128xf32>
    %145 = arith.truncf %144 : vector<16x128xf32> to vector<16x128xbf16>
    %c2_79 = arith.constant 2 : index
    %c0_80 = arith.constant 0 : index
    %c0_81 = arith.constant 0 : index
    %146 = vector.load %arg6[%c2_79, %c0_80, %c0_81] : memref<3x128x128xbf16, #tpu.memory_space<vmem>>, vector<1x128x128xbf16>
    %147 = vector.shape_cast %146 : vector<1x128x128xbf16> to vector<128x128xbf16>
    %cst_82 = arith.constant dense<0.000000e+00> : vector<16x128xf32>
    %148 = tpu.matmul %145, %147, %cst_82 {dimension_numbers = #tpu.dot_dimension_numbers<[1], [0], [0], [1], [0, 0, 1, 1], [], []>} : vector<16x128xbf16>, vector<128x128xbf16>, vector<16x128xf32> -> vector<16x128xf32>
    %c2_83 = arith.constant 2 : index
    %c0_84 = arith.constant 0 : index
    %c0_85 = arith.constant 0 : index
    %149 = vector.load %arg7[%c2_83, %c0_84, %c0_85] : memref<3x1x128xf32, #tpu.memory_space<vmem>>, vector<1x1x128xf32>
    %150 = vector.shape_cast %149 : vector<1x1x128xf32> to vector<1x128xf32>
    %151 = vector.broadcast %150 : vector<1x128xf32> to vector<16x128xf32>
    %152 = arith.addf %148, %151 : vector<16x128xf32>
    %cst_86 = arith.constant 0.000000e+00 : f32
    %153 = vector.broadcast %cst_86 : f32 to vector<16x128xf32>
    %154 = arith.maximumf %152, %153 : vector<16x128xf32>
    %155 = arith.mulf %154, %154 : vector<16x128xf32>
    %cst_87 = arith.constant dense<0.000000e+00> : vector<16xf32>
    %156 = vector.multi_reduction <add>, %155, %cst_87 [1] : vector<16x128xf32> to vector<16xf32>
    %157 = vector.shape_cast %156 : vector<16xf32> to vector<16x1xf32>
    %cst_88 = arith.constant 1.000000e-24 : f32
    %158 = vector.broadcast %cst_88 : f32 to vector<16x1xf32>
    %159 = arith.maximumf %157, %158 : vector<16x1xf32>
    %160 = math.rsqrt %159 : vector<16x1xf32>
    %161 = vector.broadcast %160 : vector<16x1xf32> to vector<16x128xf32>
    %162 = arith.mulf %154, %161 : vector<16x128xf32>
    %c0_89 = arith.constant 0 : index
    %c0_90 = arith.constant 0 : index
    %163 = vector.load %arg10[%c0_89, %c0_90] : memref<16x128xf32, #tpu.memory_space<vmem>>, vector<16x128xf32>
    tpu.vector_store %arg10[%c0_89, %c0_90], %162 {strides = array<i32>} : memref<16x128xf32, #tpu.memory_space<vmem>>, vector<16x128xf32>,
    return
  }
}

</mosaic_0001>

<bundles_post_ra>
// kernel: gnn_stack_forward.1
= control target key start
LH: loop header
LB: loop body
LE: loop exit
PB: predicated region body
PF: predicated region fallthrough
CT: control target
= control target key end

     0   :  { %15 = vsyncpa [#allocation3], 0  ;;  %s3286_s0 = inlined_call_operand.vmem [shape: f32[16,128], index: 0, kind: input, shape index: {}, may-alias: {0,10}]   ;;  %s3287_s1 = inlined_call_operand.vmem [shape: f32[48,128], index: 1, kind: input, shape index: {}]   ;;  %s3288_s2 = inlined_call_operand.vmem [shape: s32[48,1], index: 2, kind: input, shape index: {}]   ;;  %s3289_s3 = inlined_call_operand.vmem [shape: s32[48,1], index: 3, kind: input, shape index: {}]   ;;  %s3290_s4 = inlined_call_operand.vmem [shape: bf16[3,128,128], index: 4, kind: input, shape index: {}]   ;;  %s3291_s5 = inlined_call_operand.hbm [shape: f32[3,1,128], index: 5, kind: input, shape index: {}]   ;;  %s3292_s6 = inlined_call_operand.hbm [shape: bf16[3,128,128], index: 6, kind: input, shape index: {}]   ;;  %s3293_s7 = inlined_call_operand.hbm [shape: f32[3,1,128], index: 7, kind: input, shape index: {}]   ;;  %s3294_s8 = inlined_call_operand.vmem [shape: bf16[2,128,128], index: 8, kind: input, shape index: {}]   ;;  %s3295_s9 = inlined_call_operand.vmem [shape: f32[2,1,128], index: 9, kind: input, shape index: {}]   ;;  %s3296_s10 = inlined_call_operand.vmem [shape: f32[16,128], index: 10, kind: output, shape index: {}, may-alias: {0,10}]  }
   0x1   :  { %16 = vsyncpa [#allocation5], 0  ;;  %s2578_s13 = smov [#allocation4]   ;;  %s2508_s17 = scalar_lea.hbm %s3292_s6, 3072 }
   0x2   :  { %s44_s14 = sshll.u32 %s2578_s13, 4  ;;  %p2509_p0 = scmp.ne.s32.totalorder %s3292_s6, %s2508_s17  ;;  %s45_s14 = int_to_ptr.vmem [resolvable:$true] %s44_s14 }
   0x3   :  { %p2512_p1 = scmp.lt.u32.totalorder %s2508_s17, %s3292_s6 }
   0x5   :  { %p2514_p2 = pnand %p2512_p1, %p2509_p0 }
   0x7   :  { %2517 = shalt.err (!%p2514_p2)
}
   0x8   :  { %s2518_s22 = scalar_lea.vmem %s45_s14, 3072  ;;  %p2523_p4 = scmp.lt.s32.totalorder %s45_s14, %s45_s14 }
   0x9   :  { %p2519_p3 = scmp.ne.s32.totalorder %s45_s14, %s2518_s22  ;;  %p2524_p5 = scmp.lt.s32.totalorder %s2518_s22, %s2518_s22 }
   0xb   :  { %p2525_p6 = por %p2524_p5, %p2523_p4 }
   0xd   :  { %p2526_p7 = pnand %p2525_p6, %p2519_p3 }
   0xf   :  { %2529 = shalt.err (!%p2526_p7)
}
  0x10   :  { %s2579_s23 = smov 64   ;;  %s2580_s24 = smov 4  }
  0x11   :  { %50 = dma.hbm_to_vmem [thread:$0]  %s3292_s6, 3072, %s45_s14, [#allocation5], %s2579_s23, %s2579_s23, %s2580_s24  }
  0x12   :  { %s2581_s27 = smov [#allocation2]   ;;  %s2530_s11 = scalar_lea.hbm %s3291_s5, 48 }
  0x13   :  { %s32_s28 = sshll.u32 %s2581_s27, 4  ;;  %p2531_p8 = scmp.ne.s32.totalorder %s3291_s5, %s2530_s11  ;;  %s33_s28 = int_to_ptr.vmem [resolvable:$true] %s32_s28 }
  0x14   :  { %p2534_p9 = scmp.lt.u32.totalorder %s2530_s11, %s3291_s5 }
  0x16   :  { %p2536_p10 = pnand %p2534_p9, %p2531_p8 }
  0x18   :  { %2539 = shalt.err (!%p2536_p10)
}
  0x19   :  { %s2540_s17 = scalar_lea.vmem %s33_s28, 48  ;;  %s2544_s6 = scalar_lea.vmem %s33_s28, 64 }
  0x1a   :  { %p2541_p11 = scmp.ne.s32.totalorder %s33_s28, %s2540_s17  ;;  %p2545_p12 = scmp.lt.s32.totalorder %s33_s28, %s33_s28 }
  0x1b   :  { %p2546_p13 = scmp.lt.s32.totalorder %s2544_s6, %s2540_s17 }
  0x1d   :  { %p2547_p0 = por %p2546_p13, %p2545_p12 }
  0x1f   :  { %p2548_p1 = pnand %p2547_p0, %p2541_p11 }
  0x21   :  { %2551 = shalt.err (!%p2548_p1)
}
  0x22   :  { %s2582_s14 = smov 16   ;;  %s2583_s18 = smov 1  }
  0x23   :  { %38 = dma.hbm_to_vmem [thread:$0]  %s3291_s5, 48, %s33_s28, [#allocation3], %s2582_s14, %s2582_s14, %s2583_s18  }
  0x24   :  { %s2584_s21 = smov [#allocation6]   ;;  %s2552_s26 = scalar_lea.hbm %s3293_s7, 48 }
  0x25   :  { %s56_s22 = sshll.u32 %s2584_s21, 4  ;;  %p2553_p2 = scmp.ne.s32.totalorder %s3293_s7, %s2552_s26  ;;  %s57_s22 = int_to_ptr.vmem [resolvable:$true] %s56_s22 }
  0x26   :  { %p2556_p3 = scmp.lt.u32.totalorder %s2552_s26, %s3293_s7 }
  0x28   :  { %p2558_p4 = pnand %p2556_p3, %p2553_p2 }
  0x2a   :  { %2561 = shalt.err (!%p2558_p4)
}
  0x2b   :  { %s2562_s12 = scalar_lea.vmem %s57_s22, 48  ;;  %s2566_s5 = scalar_lea.vmem %s57_s22, 64 }
  0x2c   :  { %p2563_p5 = scmp.ne.s32.totalorder %s57_s22, %s2562_s12  ;;  %p2567_p6 = scmp.lt.s32.totalorder %s57_s22, %s57_s22 }
  0x2d   :  { %p2568_p7 = scmp.lt.s32.totalorder %s2566_s5, %s2562_s12 }
  0x2f   :  { %p2569_p8 = por %p2568_p7, %p2567_p6 }
  0x31   :  { %p2570_p9 = pnand %p2569_p8, %p2563_p5 }
  0x33   :  { %2573 = shalt.err (!%p2570_p9)
}
  0x34   :  { %62 = dma.hbm_to_vmem [thread:$0]  %s3293_s7, 48, %s57_s22, [#allocation5], %s2582_s14, %s2582_s14, %s2583_s18  }
  0x35   :  { %2574 = dma.done.wait [#allocation3], 48  }
  0x36   :  { %2575 = vsyncadd [#allocation3], 4294967248 }
  0x37   :  { %2576 = dma.done.wait [#allocation5], 3120  }
  0x38   :  { %2577 = vsyncadd [#allocation5], 4294964176  ;;  %v2585_v0 = vmov 0   ;;  %v2586_v1 = vmov 0.0   ;;  %v79_v2 = vld [vmem:[%s3288_s2 + $0x10] sm:$0xff]  ;;  %v77_v3 = vld [vmem:[%s3288_s2] sm:$0xff]  ;;  %v89_v18 = vlaneseq }
  0x39   :  { %2429 = vset.pattern.permute.xlu1 %v2585_v0  ;;  %2428 = vset.pattern.permute.xlu0 %v2585_v0  ;;  %v80_v4 = vld [vmem:[%s3288_s2 + $0x18] sm:$0xff]  ;;  %v78_v5 = vld [vmem:[%s3288_s2 + $0x8] sm:$0xff]  ;;  %v81_v7 = vld [vmem:[%s3288_s2 + $0x20] sm:$0xff]  ;;  %vm2587_vm0 = vmmov 0   ;;  %vm169_vm3 = vcmask 130048   ;;  %vm454_vm14 = vcmask 392192  }
  0x3a   :  { %2118 = vmatprep.subr.bf16.mxu0 %v2586_v1  ;;  %2132 = vmatprep.subr.bf16.mxu1 %v2586_v1  ;;  %v82_v6 = vld [vmem:[%s3288_s2 + $0x28] sm:$0xff]  ;;  %v2704_v8 = vld [vmem:[%s3286_s0] sm:$0xff]  ;;  %v86_v13 = vld [vmem:[%s3289_s3 + $0x18] sm:$0xff]  ;;  %v90_v19 = vand.u32 127, %v89_v18 }
  0x3b   :  { %98 = vperm.xlu1 %2429, %v79_v2   ;;  %92 = vperm.xlu0 %2428, %v77_v3   ;;  %v2709_v9 = vld [vmem:[%s3286_s0 + $0x8] sm:$0xff]  ;;  %v83_v12 = vld [vmem:[%s3289_s3] sm:$0xff]  ;;  %v85_v14 = vld [vmem:[%s3289_s3 + $0x10] sm:$0xff] }
  0x3c   :  { %v221_v10 = vpack.c.bf16 %v2709_v9, %v2704_v8  ;;  %v84_v11 = vld [vmem:[%s3289_s3 + $0x8] sm:$0xff]  ;;  %2120 = vmatprep.mubr.msk.bf16.mxu0 %vm2587_vm0, %v2586_v1  ;;  %2148 = vmatprep.mubr.msk.bf16.mxu1 %vm2587_vm0, %v2586_v1  ;;  %v87_v16 = vld [vmem:[%s3289_s3 + $0x20] sm:$0xff] }
  0x3d   :  { %v88_v15 = vld [vmem:[%s3289_s3 + $0x28] sm:$0xff]  ;;  %v2430_v17 = vld [vmem:[%s3290_s4] sm:$0xff]  }
  0x3e   :  { %2119 = vmatpush3.bf16.msra.mxu0 %v221_v10  ;;  %2133 = vmatpush3.bf16.msra.mxu1 %v2430_v17 }
  0x3f   :  { %101 = vperm.xlu1 %2429, %v80_v4   ;;  %95 = vperm.xlu0 %2428, %v78_v5  }
  0x40   :  { %2170 = vmatprep.subr.bf16.mxu0 %v2586_v1  ;;  %2134 = vmatprep.subr.bf16.mxu1 %v2586_v1 }
  0x43   :  { %107 = vperm.xlu1 %2429, %v82_v6   ;;  %104 = vperm.xlu0 %2428, %v81_v7  }
  0x47   :  { %119 = vperm.xlu1 %2429, %v84_v11   ;;  %116 = vperm.xlu0 %2428, %v83_v12  }
  0x4b   :  { %125 = vperm.xlu1 %2429, %v86_v13   ;;  %122 = vperm.xlu0 %2428, %v85_v14  }
  0x4f   :  { %131 = vperm.xlu1 %2429, %v88_v15   ;;  %128 = vperm.xlu0 %2428, %v87_v16  }
  0xba   :  { %v99_v20 = vpop.permute.xlu1 %98  ;;  %v93_v21 = vpop.permute.xlu0 %92 }
  0xbb   :  { %vm109_vm1 = vcmp.eq.s32.totalorder %v93_v21, %v90_v19  ;;  %vm111_vm4 = vcmp.eq.s32.totalorder %v99_v20, %v90_v19  ;;  %v2431_v20 = vld [vmem:[%s3290_s4 + $0x8] sm:$0xff]   ;;  %v2432_v21 = vld [vmem:[%s3290_s4 + $0x10] sm:$0xff]  }
  0xbc   :  { %v1859_v24 = vsel %vm109_vm1, 1.0, %v2586_v1  ;;  %v1861_v29 = vsel %vm111_vm4, 1.0, %v2586_v1  ;;  %2135 = vmatpush3.bf16.msra.mxu1 %v2431_v20 }
  0xbd   :  { %2136 = vmatprep.subr.bf16.mxu1 %v2586_v1 }
  0xbe   :  { %v102_v22 = vpop.permute.xlu1 %101  ;;  %v96_v23 = vpop.permute.xlu0 %95 }
  0xbf   :  { %vm110_vm2 = vcmp.eq.s32.totalorder %v96_v23, %v90_v19  ;;  %vm112_vm5 = vcmp.eq.s32.totalorder %v102_v22, %v90_v19  ;;  %v2433_v22 = vld [vmem:[%s3290_s4 + $0x18] sm:$0xff]   ;;  %v2434_v23 = vld [vmem:[%s3290_s4 + $0x20] sm:$0xff]  }
  0xc0   :  { %v1860_v25 = vsel %vm110_vm2, 1.0, %v2586_v1  ;;  %v1862_v30 = vsel %vm112_vm5, 1.0, %v2586_v1  ;;  %2137 = vmatpush3.bf16.msra.mxu1 %v2432_v21 }
  0xc1   :  { %v2742_v26 = vpack.c.bf16 %v1860_v25, %v1859_v24  ;;  %v2752_v35 = vpack.c.bf16 %v1862_v30, %v1861_v29  ;;  %2138 = vmatprep.subr.bf16.mxu1 %v2586_v1  ;;  %v2435_v24 = vld [vmem:[%s3290_s4 + $0x28] sm:$0xff]   ;;  %v2436_v25 = vld [vmem:[%s3290_s4 + $0x30] sm:$0xff]  }
  0xc2   :  { %v108_v27 = vpop.permute.xlu1 %107  ;;  %v105_v28 = vpop.permute.xlu0 %104 }
  0xc3   :  { %2121 = vmatmul.mubr.msk.bf16.vlgmr.msra.gmra.mrb[0].mxu0 %vm169_vm3, %v2742_v26  ;;  %vm114_vm8 = vcmp.eq.s32.totalorder %v108_v27, %v90_v19  ;;  %vm113_vm9 = vcmp.eq.s32.totalorder %v105_v28, %v90_v19  ;;  %v2437_v27 = vld [vmem:[%s3290_s4 + $0x38] sm:$0xff]  }
  0xc4   :  { %2124 = vmatprep.mubr.msk.bf16.mxu0 %vm2587_vm0, %v2586_v1  ;;  %v1864_v46 = vsel %vm114_vm8, 1.0, %v2586_v1  ;;  %v1863_v47 = vsel %vm113_vm9, 1.0, %v2586_v1  ;;  %2139 = vmatpush3.bf16.msra.mxu1 %v2433_v22 }
  0xc5   :  { %v2772_v55 = vpack.c.bf16 %v1864_v46, %v1863_v47  ;;  %2140 = vmatprep.subr.bf16.mxu1 %v2586_v1  ;;  %v2852_v47 = vld [vmem:[%s3287_s1 + $0x20] sm:$0xff] }
  0xc6   :  { %v120_v31 = vpop.permute.xlu1 %119  ;;  %v117_v32 = vpop.permute.xlu0 %116 }
  0xc7   :  { %vm134_vm6 = vcmp.eq.s32.totalorder %v120_v31, %v90_v19  ;;  %vm133_vm7 = vcmp.eq.s32.totalorder %v117_v32, %v90_v19 }
  0xc8   :  { %v1854_v33 = vsel %vm134_vm6, 1.0, %v2586_v1  ;;  %v1853_v34 = vsel %vm133_vm7, 1.0, %v2586_v1  ;;  %2141 = vmatpush3.bf16.msra.mxu1 %v2434_v23 }
  0xc9   :  { %v171_v36 = vsel %vm169_vm3, %v1854_v33, 0.0  ;;  %v2755_v37 = vpack.c.bf16 %v1854_v33, %v1853_v34  ;;  %v170_v38 = vsel %vm169_vm3, %v1853_v34, 0.0  ;;  %2142 = vmatprep.subr.bf16.mxu1 %v2586_v1 }
  0xca   :  { %v126_v39 = vpop.permute.xlu1 %125  ;;  %v123_v40 = vpop.permute.xlu0 %122  ;;  %v172_v41 = vadd.f32 %v171_v36, %v170_v38  ;;  %v2838_v36 = vld [vmem:[%s3287_s1 + $0x10] sm:$0xff] }
  0xcb   :  { %vm136_vm10 = vcmp.eq.s32.totalorder %v126_v39, %v90_v19  ;;  %vm135_vm11 = vcmp.eq.s32.totalorder %v123_v40, %v90_v19  ;;  %2125 = vmatmul.mubr.msk.bf16.gmra.mrb[4].mxu0 %vm169_vm3, %v2752_v35  ;;  %v2843_v39 = vld [vmem:[%s3287_s1 + $0x18] sm:$0xff] }
  0xcc   :  { %v1856_v42 = vsel %vm136_vm10, 1.0, %v2586_v1  ;;  %v1855_v43 = vsel %vm135_vm11, 1.0, %v2586_v1  ;;  %2128 = vmatprep.mubr.msk.bf16.mxu0 %vm2587_vm0, %v2586_v1  ;;  %2143 = vmatpush3.bf16.msra.mxu1 %v2435_v24 }
  0xcd   :  { %v2764_v44 = vpack.c.bf16 %v1856_v42, %v1855_v43  ;;  %v173_v45 = vsel %vm169_vm3, %v1855_v43, 0.0  ;;  %v175_v51 = vsel %vm169_vm3, %v1856_v42, 0.0  ;;  %2144 = vmatprep.subr.bf16.mxu1 %v2586_v1 }
  0xce   :  { %v174_v48 = vadd.f32 %v173_v45, %v172_v41  ;;  %v132_v49 = vpop.permute.xlu1 %131  ;;  %v129_v50 = vpop.permute.xlu0 %128 }
  0xcf   :  { %vm138_vm12 = vcmp.eq.s32.totalorder %v132_v49, %v90_v19  ;;  %vm137_vm13 = vcmp.eq.s32.totalorder %v129_v50, %v90_v19  ;;  %v2857_v49 = vld [vmem:[%s3287_s1 + $0x28] sm:$0xff] }
  0xd0   :  { %v1858_v52 = vsel %vm138_vm12, 1.0, %v2586_v1  ;;  %v176_v53 = vadd.f32 %v175_v51, %v174_v48  ;;  %v1857_v54 = vsel %vm137_vm13, 1.0, %v2586_v1  ;;  %2145 = vmatpush3.bf16.msra.mxu1 %v2436_v25 }
  0xd1   :  { %v2774_v56 = vpack.c.bf16 %v1858_v52, %v1857_v54  ;;  %v177_v57 = vsel %vm169_vm3, %v1857_v54, 0.0  ;;  %v179_v59 = vsel %vm169_vm3, %v1858_v52, 0.0  ;;  %2146 = vmatprep.subr.bf16.mxu1 %v2586_v1 }
  0xd2   :  { %v178_v58 = vadd.f32 %v177_v57, %v176_v53 }
  0xd3   :  { %2129 = vmatmul.mubr.msk.bf16.gmra.mrb[8].mxu0 %vm169_vm3, %v2772_v55 }
  0xd4   :  { %v180_v60 = vadd.f32 %v179_v59, %v178_v58  ;;  %2186 = vmatprep.mubr.msk.bf16.mxu0 %vm2587_vm0, %v2586_v1  ;;  %2147 = vmatpush3.bf16.msra.mxu1 %v2437_v27  ;;  %v2438_v58 = vld [vmem:[#allocation4] sm:$0xff]   ;;  %v2439_v59 = vld [vmem:[#allocation4 + $0x8] sm:$0xff]  }
  0xd5   :  { %2160 = vmatprep.subr.bf16.mxu1 %v2586_v1  ;;  %2171 = vmatpush3.bf16.msra.mxu0 %v2438_v58 }
  0xd6   :  { %v181_v61 = vrot.slane %v180_v60, 4  ;;  %2172 = vmatprep.subr.bf16.mxu0 %v2586_v1 }
  0xd8   :  { %v182_v62 = vadd.f32 %v181_v61, %v180_v60  ;;  %v2440_v60 = vld [vmem:[#allocation4 + $0x10] sm:$0xff]   ;;  %v2441_v61 = vld [vmem:[#allocation4 + $0x18] sm:$0xff]  }
  0xd9   :  { %2173 = vmatpush3.bf16.msra.mxu0 %v2439_v59 }
  0xda   :  { %v183_v63 = vrot.slane %v182_v62, 2  ;;  %2174 = vmatprep.subr.bf16.mxu0 %v2586_v1 }
  0xdc   :  { %v184_v0 = vadd.f32 %v183_v63, %v182_v62  ;;  %v2442_v62 = vld [vmem:[#allocation4 + $0x20] sm:$0xff]   ;;  %v2443_v63 = vld [vmem:[#allocation4 + $0x28] sm:$0xff]  }
  0xdd   :  { %2175 = vmatpush3.bf16.msra.mxu0 %v2440_v60 }
  0xde   :  { %v185_v2 = vrot.slane %v184_v0, 1  ;;  %2176 = vmatprep.subr.bf16.mxu0 %v2586_v1 }
  0xe0   :  { %v186_v3 = vadd.f32 %v185_v2, %v184_v0  ;;  %v1868_v0 = vld [vmem:[#allocation2] ss:$0 sm:$0xff] }
  0xe1   :  { %2177 = vmatpush3.bf16.msra.mxu0 %v2441_v61 }
  0xe2   :  { %v187_v4 = vmax.f32 %v186_v3, 1.0  ;;  %2178 = vmatprep.subr.bf16.mxu0 %v2586_v1 }
  0xe4   :  { %2494 = vrcp.f32 %v187_v4 }
  0xe5   :  { %2179 = vmatpush3.bf16.msra.mxu0 %v2442_v62 }
  0xe6   :  { %2180 = vmatprep.subr.bf16.mxu0 %v2586_v1 }
  0xe9   :  { %2181 = vmatpush3.bf16.msra.mxu0 %v2443_v63 }
  0xea   :  { %2182 = vmatprep.subr.bf16.mxu0 %v2586_v1 }
  0xee   :  { %v2495_v5 = vpop.eup %2494 }
  0xef   :  { %v190_v6 = vmul.f32 %v2495_v5, %v1854_v33  ;;  %v189_v7 = vmul.f32 %v2495_v5, %v1853_v34  ;;  %v193_v12 = vmul.f32 %v2495_v5, %v1857_v54  ;;  %v191_v13 = vmul.f32 %v2495_v5, %v1855_v43 }
  0xf0   :  { %v192_v16 = vmul.f32 %v2495_v5, %v1856_v42  ;;  %v194_v18 = vmul.f32 %v2495_v5, %v1858_v52 }
  0xf1   :  { %v198_v10 = vsel %vm169_vm3, %v190_v6, 0.0  ;;  %v195_v11 = vsel %vm169_vm3, %v189_v7, 0.0  ;;  %v207_v14 = vsel %vm169_vm3, %v193_v12, 0.0  ;;  %v201_v15 = vsel %vm169_vm3, %v191_v13, 0.0 }
  0xf2   :  { %199 = vadd.xlane.f32.xlu1 %v198_v10  ;;  %196 = vadd.xlane.f32.xlu0 %v195_v11  ;;  %v204_v17 = vsel %vm169_vm3, %v192_v16, 0.0  ;;  %v210_v19 = vsel %vm169_vm3, %v194_v18, 0.0 }
  0xf6   :  { %208 = vadd.xlane.f32.xlu1 %v207_v14  ;;  %202 = vadd.xlane.f32.xlu0 %v201_v15 }
  0xfa   :  { %205 = vadd.xlane.f32.xlu0 %v204_v17 }
  0xfe   :  { %211 = vadd.xlane.f32.xlu0 %v210_v19 }
 0x114   :  { %434 = vrot.lane.b32.xlu0 %v2704_v8, %s2579_s23  ;;  %v2826_v8 = vld [vmem:[%s3287_s1] sm:$0xff] }
 0x118   :  { %436 = vrot.lane.b32.xlu0 %v2709_v9, %s2579_s23  ;;  %v2831_v9 = vld [vmem:[%s3287_s1 + $0x8] sm:$0xff] }
 0x123   :  { %438 = vxpose.xlu1.c.b16.start [1/3] (short) (narrow) %v2755_v37, 16 }
 0x127   :  { %439 = vxpose.xlu1.c.b16.cont [2/3] (short) (narrow) %v2764_v44, 16 }
 0x12b   :  { %440 = vxpose.xlu1.c.b16.end [3/3] (short) (narrow) %v2774_v56, 16 }
 0x17f   :  { %v2871_v5 = vpop.xlane.xlu0 %196  ;;  %v2873_v13 = vpop.xlane.xlu1 %199 }
 0x183   :  { %v2877_v16 = vpop.xlane.xlu0 %202 }
 0x187   :  { %v2880_v27 = vpop.xlane.xlu0 %205 }
 0x196   :  { %v265_v28 = vpop.f32.mrb[0].mxu0 }
 0x197   :  { %v2122_v29 = vpop.f32.mrb[1].mxu0  ;;  %v266_v31 = vadd.f32 %v265_v28, %v2826_v8 }
 0x198   :  { %v268_v30 = vpop.f32.mrb[2].mxu0 }
 0x199   :  { %v269_v32 = vadd.f32 %v268_v30, %v2831_v9  ;;  %v2123_v33 = vpop.f32.mrb[3].mxu0 }
 0x19b   :  { %v288_v34 = vpack.c.bf16 %v269_v32, %v266_v31 }
 0x19d   :  { %2149 = vmatmul.mubr.bf16.vlgmr.msra.gmra.mrb[0].mxu1 %v288_v34 }
 0x19e   :  { %v273_v38 = vpop.f32.mrb[4].mxu0  ;;  %2152 = vmatprep.mubr.msk.bf16.mxu1 %vm2587_vm0, %v2586_v1 }
 0x19f   :  { %v2126_v40 = vpop.f32.mrb[5].mxu0  ;;  %v274_v42 = vadd.f32 %v273_v38, %v2838_v36 }
 0x1a0   :  { %v276_v41 = vpop.f32.mrb[6].mxu0 }
 0x1a1   :  { %v277_v43 = vadd.f32 %v276_v41, %v2843_v39  ;;  %v2127_v45 = vpop.f32.mrb[7].mxu0 }
 0x1a2   :  { %v2887_v45 = vpop.xlane.xlu0 %211 }
 0x1a3   :  { %v289_v46 = vpack.c.bf16 %v277_v43, %v274_v42  ;;  %v2885_v43 = vpop.xlane.xlu1 %208 }
 0x1a5   :  { %2153 = vmatmul.mubr.bf16.gmra.mrb[4].mxu1 %v289_v46 }
 0x1a6   :  { %v281_v48 = vpop.f32.mrb[8].mxu0  ;;  %2156 = vmatprep.mubr.msk.bf16.mxu1 %vm2587_vm0, %v2586_v1 }
 0x1a7   :  { %v2130_v50 = vpop.f32.mrb[9].mxu0  ;;  %v282_v52 = vadd.f32 %v281_v48, %v2852_v47 }
 0x1a8   :  { %v284_v51 = vpop.f32.mrb[10].mxu0 }
 0x1a9   :  { %v285_v53 = vadd.f32 %v284_v51, %v2857_v49  ;;  %v2131_v54 = vpop.f32.mrb[11].mxu0  ;;  %v2891_v51 = vpop.trf.xlu1 }
 0x1aa   :  { %v435_v54 = vpop.permute.xlu0 %434 }
 0x1ab   :  { %v290_v57 = vpack.c.bf16 %v285_v53, %v282_v52  ;;  %v2444_v52 = vld [vmem:[#allocation4 + $0x30] sm:$0xff]   ;;  %v2445_v53 = vld [vmem:[#allocation4 + $0x38] sm:$0xff]  }
 0x1ac   :  { %2183 = vmatpush3.bf16.msra.mxu0 %v2444_v52 }
 0x1ad   :  { %2157 = vmatmul.mubr.bf16.gmra.mrb[8].mxu1 %v290_v57  ;;  %2184 = vmatprep.subr.bf16.mxu0 %v2586_v1 }
 0x1ae   :  { %2166 = vmatprep.mubr.msk.bf16.mxu1 %vm2587_vm0, %v2586_v1  ;;  %v437_v58 = vpop.permute.xlu0 %436 }
 0x1b0   :  { %2185 = vmatpush3.bf16.msra.mxu0 %v2445_v53 }
 0x1b1   :  { %2204 = vmatprep.subr.bf16.mxu0 %v2586_v1 }
 0x270   :  { %v396_v2 = vpop.f32.mrb[0].mxu1 }
 0x271   :  { %v397_v3 = vadd.f32 %v1868_v0, %v396_v2  ;;  %v2150_v4 = vpop.f32.mrb[1].mxu1  ;;  %v1878_v2 = vld [vmem:[#allocation6] ss:$0 sm:$0xff] }
 0x272   :  { %v399_v6 = vpop.f32.mrb[2].mxu1 }
 0x273   :  { %v419_v7 = vmax.f32 %v397_v3, 0.0  ;;  %v400_v10 = vadd.f32 %v1868_v0, %v399_v6  ;;  %v2151_v11 = vpop.f32.mrb[3].mxu1 }
 0x275   :  { %v420_v12 = vmax.f32 %v400_v10, 0.0  ;;  %v425_v14 = vmul.f32 %v419_v7, %v2871_v5 }
 0x277   :  { %v426_v15 = vmul.f32 %v420_v12, %v2873_v13 }
 0x278   :  { %v404_v17 = vpop.f32.mrb[4].mxu1 }
 0x279   :  { %v431_v18 = vpack.c.bf16 %v426_v15, %v425_v14  ;;  %v405_v19 = vadd.f32 %v1868_v0, %v404_v17  ;;  %v2154_v20 = vpop.f32.mrb[5].mxu1 }
 0x27a   :  { %v407_v21 = vpop.f32.mrb[6].mxu1 }
 0x27b   :  { %v421_v22 = vmax.f32 %v405_v19, 0.0  ;;  %v408_v23 = vadd.f32 %v1868_v0, %v407_v21  ;;  %v2155_v24 = vpop.f32.mrb[7].mxu1  ;;  %2161 = vmatpush3.bf16.msra.mxu1 %v431_v18 }
 0x27c   :  { %2162 = vmatprep.subr.bf16.mxu1 %v2586_v1 }
 0x27d   :  { %v422_v25 = vmax.f32 %v408_v23, 0.0  ;;  %v427_v28 = vmul.f32 %v421_v22, %v2877_v16 }
 0x27f   :  { %v428_v29 = vmul.f32 %v422_v25, %v2880_v27 }
 0x280   :  { %v412_v30 = vpop.f32.mrb[8].mxu1 }
 0x281   :  { %v432_v31 = vpack.c.bf16 %v428_v29, %v427_v28  ;;  %v413_v32 = vadd.f32 %v1868_v0, %v412_v30  ;;  %v2158_v33 = vpop.f32.mrb[9].mxu1  ;;  %v2446_v29 = vld [vmem:[%s3294_s8] sm:$0xff]   ;;  %v2447_v30 = vld [vmem:[%s3294_s8 + $0x8] sm:$0xff]  }
 0x282   :  { %v415_v34 = vpop.f32.mrb[10].mxu1  ;;  %v2450_v33 = vld [vmem:[%s3294_s8 + $0x20] sm:$0xff]  }
 0x283   :  { %v423_v38 = vmax.f32 %v413_v32, 0.0  ;;  %v416_v40 = vadd.f32 %v1868_v0, %v415_v34  ;;  %v2159_v41 = vpop.f32.mrb[11].mxu1  ;;  %2163 = vmatpush3.bf16.msra.mxu1 %v432_v31  ;;  %v2448_v31 = vld [vmem:[%s3294_s8 + $0x10] sm:$0xff]   ;;  %v2449_v32 = vld [vmem:[%s3294_s8 + $0x18] sm:$0xff]   ;;  %v2451_v34 = vld [vmem:[%s3294_s8 + $0x28] sm:$0xff]  }
 0x284   :  { %2164 = vmatprep.subr.bf16.mxu1 %v2586_v1 }
 0x285   :  { %v424_v42 = vmax.f32 %v416_v40, 0.0  ;;  %v429_v46 = vmul.f32 %v423_v38, %v2885_v43  ;;  %v2452_v38 = vld [vmem:[%s3294_s8 + $0x30] sm:$0xff]   ;;  %v2453_v40 = vld [vmem:[%s3294_s8 + $0x38] sm:$0xff]  }
 0x287   :  { %v430_v48 = vmul.f32 %v424_v42, %v2887_v45 }
 0x289   :  { %v433_v50 = vpack.c.bf16 %v430_v48, %v429_v46 }
 0x28b   :  { %2165 = vmatpush3.bf16.msra.mxu1 %v433_v50 }
 0x28c   :  { %2190 = vmatprep.subr.bf16.mxu1 %v2586_v1 }
 0x28e   :  { %2167 = vmatmul.mubr.msk.bf16.vlgmr.msra.gmra.mrb[12].mxu1 %vm454_vm14, %v2891_v51 }
 0x28f   :  { %2192 = vmatprep.mubr.msk.bf16.mxu1 %vm2587_vm0, %v2586_v1 }
 0x361   :  { %v492_v57 = vpop.f32.mrb[12].mxu1 }
 0x362   :  { %v2168_v59 = vpop.f32.mrb[13].mxu1  ;;  %v493_v61 = vadd.f32 %v492_v57, %v435_v54 }
 0x363   :  { %v495_v60 = vpop.f32.mrb[14].mxu1 }
 0x364   :  { %v496_v62 = vadd.f32 %v495_v60, %v437_v58  ;;  %v2169_v63 = vpop.f32.mrb[15].mxu1 }
 0x366   :  { %v499_v0 = vpack.c.bf16 %v496_v62, %v493_v61 }
 0x368   :  { %2187 = vmatmul.mubr.bf16.vlgmr.msra.gmra.mrb[12].mxu0 %v499_v0 }
 0x369   :  { %2206 = vmatprep.mubr.msk.bf16.mxu0 %vm2587_vm0, %v2586_v1 }
 0x43b   :  { %v605_v3 = vpop.f32.mrb[12].mxu0 }
 0x43c   :  { %v606_v4 = vadd.f32 %v1878_v2, %v605_v3  ;;  %v2188_v6 = vpop.f32.mrb[13].mxu0  ;;  %v2455_v3 = vld [vmem:[%s3290_s4 + $0x48] sm:$0xff]  }
 0x43d   :  { %v608_v7 = vpop.f32.mrb[14].mxu0 }
 0x43e   :  { %v612_v10 = vmax.f32 %v606_v4, 0.0  ;;  %v609_v11 = vadd.f32 %v1878_v2, %v608_v7  ;;  %v2189_v12 = vpop.f32.mrb[15].mxu0  ;;  %v2454_v2 = vld [vmem:[%s3290_s4 + $0x40] sm:$0xff]  }
 0x440   :  { %v613_v14 = vmax.f32 %v609_v11, 0.0  ;;  %v614_v15 = vmul.f32 %v612_v10, %v612_v10 }
 0x442   :  { %616 = vadd.xlane.f32.xlu0 %v614_v15  ;;  %v615_v17 = vmul.f32 %v613_v14, %v613_v14 }
 0x444   :  { %618 = vadd.xlane.f32.xlu1 %v615_v17 }
 0x4cf   :  { %v617_v18 = vpop.xlane.xlu0 %616 }
 0x4d0   :  { %v620_v19 = vmax.f32 %v617_v18, 1e-24  ;;  %v2457_v18 = vld [vmem:[%s3290_s4 + $0x58] sm:$0xff]  }
 0x4d1   :  { %v619_v20 = vpop.xlane.xlu1 %618 }
 0x4d2   :  { %2496 = vrsqrt.f32 %v620_v19  ;;  %v621_v21 = vmax.f32 %v619_v20, 1e-24  ;;  %v2458_v19 = vld [vmem:[%s3290_s4 + $0x60] sm:$0xff]  }
 0x4d4   :  { %2498 = vrsqrt.f32 %v621_v21 }
 0x4dc   :  { %v2497_v22 = vpop.eup %2496 }
 0x4dd   :  { %v2902_v24 = vmul.f32 %v2497_v22, %v612_v10 }
 0x4de   :  { %v2499_v23 = vpop.eup %2498 }
 0x4df   :  { %v2904_v25 = vmul.f32 %v2499_v23, %v613_v14  ;;  %v2456_v14 = vld [vmem:[%s3290_s4 + $0x50] sm:$0xff]  }
 0x4e1   :  { %v626_v28 = vpack.c.bf16 %v2904_v25, %v2902_v24 }
 0x4e3   :  { %2191 = vmatpush3.bf16.msra.mxu1 %v626_v28  ;;  %2205 = vmatpush3.bf16.msra.mxu0 %v626_v28 }
 0x4e4   :  { %2218 = vmatprep.subr.bf16.mxu1 %v2586_v1  ;;  %2246 = vmatprep.subr.bf16.mxu0 %v2586_v1 }
 0x4e6   :  { %2193 = vmatmul.mubr.msk.bf16.vlgmr.msra.gmra.mrb[16].mxu1 %vm169_vm3, %v2742_v26  ;;  %2207 = vmatmul.mubr.msk.bf16.vlgmr.msra.gmra.mrb[16].mxu0 %vm169_vm3, %v2755_v37 }
 0x4e7   :  { %2196 = vmatprep.mubr.msk.bf16.mxu1 %vm2587_vm0, %v2586_v1  ;;  %2210 = vmatprep.mubr.msk.bf16.mxu0 %vm2587_vm0, %v2586_v1 }
 0x4e8   :  { %2219 = vmatpush3.bf16.msra.mxu1 %v2446_v29  ;;  %2247 = vmatpush3.bf16.msra.mxu0 %v2454_v2 }
 0x4e9   :  { %2220 = vmatprep.subr.bf16.mxu1 %v2586_v1  ;;  %2248 = vmatprep.subr.bf16.mxu0 %v2586_v1 }
 0x4ec   :  { %2221 = vmatpush3.bf16.msra.mxu1 %v2447_v30  ;;  %2249 = vmatpush3.bf16.msra.mxu0 %v2455_v3 }
 0x4ed   :  { %2222 = vmatprep.subr.bf16.mxu1 %v2586_v1  ;;  %2250 = vmatprep.subr.bf16.mxu0 %v2586_v1 }
 0x4ee   :  { %2197 = vmatmul.mubr.msk.bf16.gmra.mrb[20].mxu1 %vm169_vm3, %v2752_v35  ;;  %2211 = vmatmul.mubr.msk.bf16.gmra.mrb[20].mxu0 %vm169_vm3, %v2764_v44 }
 0x4ef   :  { %2200 = vmatprep.mubr.msk.bf16.mxu1 %vm2587_vm0, %v2586_v1  ;;  %2214 = vmatprep.mubr.msk.bf16.mxu0 %vm2587_vm0, %v2586_v1 }
 0x4f0   :  { %2223 = vmatpush3.bf16.msra.mxu1 %v2448_v31  ;;  %2251 = vmatpush3.bf16.msra.mxu0 %v2456_v14 }
 0x4f1   :  { %2224 = vmatprep.subr.bf16.mxu1 %v2586_v1  ;;  %2252 = vmatprep.subr.bf16.mxu0 %v2586_v1 }
 0x4f4   :  { %2225 = vmatpush3.bf16.msra.mxu1 %v2449_v32  ;;  %2253 = vmatpush3.bf16.msra.mxu0 %v2457_v18 }
 0x4f5   :  { %2226 = vmatprep.subr.bf16.mxu1 %v2586_v1  ;;  %2254 = vmatprep.subr.bf16.mxu0 %v2586_v1 }
 0x4f6   :  { %2201 = vmatmul.mubr.msk.bf16.gmra.mrb[24].mxu1 %vm169_vm3, %v2772_v55  ;;  %2215 = vmatmul.mubr.msk.bf16.gmra.mrb[24].mxu0 %vm169_vm3, %v2774_v56 }
 0x4f7   :  { %2234 = vmatprep.mubr.msk.bf16.mxu1 %vm2587_vm0, %v2586_v1  ;;  %2262 = vmatprep.mubr.msk.bf16.mxu0 %vm2587_vm0, %v2586_v1 }
 0x4f8   :  { %2227 = vmatpush3.bf16.msra.mxu1 %v2450_v33  ;;  %2255 = vmatpush3.bf16.msra.mxu0 %v2458_v19 }
 0x4f9   :  { %2228 = vmatprep.subr.bf16.mxu1 %v2586_v1  ;;  %2256 = vmatprep.subr.bf16.mxu0 %v2586_v1 }
 0x4fc   :  { %2229 = vmatpush3.bf16.msra.mxu1 %v2451_v34 }
 0x4fd   :  { %2230 = vmatprep.subr.bf16.mxu1 %v2586_v1 }
 0x500   :  { %2231 = vmatpush3.bf16.msra.mxu1 %v2452_v38 }
 0x501   :  { %2232 = vmatprep.subr.bf16.mxu1 %v2586_v1 }
 0x504   :  { %2233 = vmatpush3.bf16.msra.mxu1 %v2453_v40 }
 0x505   :  { %2274 = vmatprep.subr.bf16.mxu1 %v2586_v1 }
 0x5b9   :  { %v2966_v41 = vpop.f32.mrb[16].mxu1  ;;  %v727_v42 = vpop.f32.mrb[16].mxu0 }
 0x5ba   :  { %750 = vrot.lane.b32.xlu0 %v727_v42, %s2579_s23  ;;  %v2194_v46 = vpop.f32.mrb[17].mxu1  ;;  %v2208_v48 = vpop.f32.mrb[17].mxu0 }
 0x5bb   :  { %v2969_v50 = vpop.f32.mrb[18].mxu1  ;;  %v730_v52 = vpop.f32.mrb[18].mxu0 }
 0x5bc   :  { %752 = vrot.lane.b32.xlu1 %v730_v52, %s2579_s23  ;;  %v2195_v53 = vpop.f32.mrb[19].mxu1  ;;  %v2209_v54 = vpop.f32.mrb[19].mxu0 }
 0x5c1   :  { %v2972_v57 = vpop.f32.mrb[20].mxu1  ;;  %v735_v58 = vpop.f32.mrb[20].mxu0 }
 0x5c2   :  { %754 = vrot.lane.b32.xlu0 %v735_v58, %s2579_s23  ;;  %v2198_v59 = vpop.f32.mrb[21].mxu1  ;;  %v2212_v60 = vpop.f32.mrb[21].mxu0 }
 0x5c3   :  { %v2975_v61 = vpop.f32.mrb[22].mxu1  ;;  %v738_v62 = vpop.f32.mrb[22].mxu0 }
 0x5c4   :  { %756 = vrot.lane.b32.xlu1 %v738_v62, %s2579_s23  ;;  %v2199_v63 = vpop.f32.mrb[23].mxu1  ;;  %v2213_v0 = vpop.f32.mrb[23].mxu0 }
 0x5c9   :  { %v2985_v4 = vpop.f32.mrb[24].mxu1  ;;  %v743_v6 = vpop.f32.mrb[24].mxu0 }
 0x5ca   :  { %758 = vrot.lane.b32.xlu0 %v743_v6, %s2579_s23  ;;  %v2202_v7 = vpop.f32.mrb[25].mxu1  ;;  %v2216_v10 = vpop.f32.mrb[25].mxu0 }
 0x5cb   :  { %v2988_v11 = vpop.f32.mrb[26].mxu1  ;;  %v746_v12 = vpop.f32.mrb[26].mxu0 }
 0x5cc   :  { %760 = vrot.lane.b32.xlu1 %v746_v12, %s2579_s23  ;;  %v2203_v15 = vpop.f32.mrb[27].mxu1  ;;  %v2217_v17 = vpop.f32.mrb[27].mxu0 }
 0x5ce   :  { %1065 = vrot.lane.b32.xlu0 %v2902_v24, %s2579_s23 }
 0x5d0   :  { %1067 = vrot.lane.b32.xlu1 %v2904_v25, %s2579_s23 }
 0x62c   :  { %v751_v20 = vpop.permute.xlu0 %750 }
 0x62d   :  { %v762_v21 = vadd.f32 %v751_v20, %v2966_v41 }
 0x62e   :  { %v753_v22 = vpop.permute.xlu1 %752 }
 0x62f   :  { %v763_v23 = vadd.f32 %v753_v22, %v2969_v50  ;;  %v768_v24 = vadd.f32 %v762_v21, %v2826_v8 }
 0x631   :  { %v769_v25 = vadd.f32 %v763_v23, %v2831_v9 }
 0x633   :  { %v774_v28 = vpack.c.bf16 %v769_v25, %v768_v24 }
 0x634   :  { %v755_v29 = vpop.permute.xlu0 %754 }
 0x635   :  { %v764_v30 = vadd.f32 %v755_v29, %v2972_v57  ;;  %2235 = vmatmul.mubr.bf16.vlgmr.msra.gmra.mrb[28].mxu1 %v774_v28 }
 0x636   :  { %v757_v31 = vpop.permute.xlu1 %756  ;;  %2238 = vmatprep.mubr.msk.bf16.mxu1 %vm2587_vm0, %v2586_v1 }
 0x637   :  { %v765_v32 = vadd.f32 %v757_v31, %v2975_v61  ;;  %v770_v33 = vadd.f32 %v764_v30, %v2838_v36  ;;  %v2459_v36 = vld [vmem:[%s3290_s4 + $0x68] sm:$0xff]  }
 0x638   :  { %2257 = vmatpush3.bf16.msra.mxu0 %v2459_v36 }
 0x639   :  { %v771_v34 = vadd.f32 %v765_v32, %v2843_v39  ;;  %2258 = vmatprep.subr.bf16.mxu0 %v2586_v1  ;;  %v2460_v39 = vld [vmem:[%s3290_s4 + $0x70] sm:$0xff]   ;;  %v2462_v32 = vld [vmem:[#allocation4 + $0x40] sm:$0xff]  }
 0x63b   :  { %v775_v38 = vpack.c.bf16 %v771_v34, %v770_v33  ;;  %v2463_v33 = vld [vmem:[#allocation4 + $0x48] sm:$0xff]   ;;  %v2464_v34 = vld [vmem:[#allocation4 + $0x50] sm:$0xff]  }
 0x63c   :  { %v759_v40 = vpop.permute.xlu0 %758  ;;  %2259 = vmatpush3.bf16.msra.mxu0 %v2460_v39 }
 0x63d   :  { %v766_v8 = vadd.f32 %v759_v40, %v2985_v4  ;;  %2239 = vmatmul.mubr.bf16.gmra.mrb[32].mxu1 %v775_v38  ;;  %2260 = vmatprep.subr.bf16.mxu0 %v2586_v1  ;;  %v2467_v38 = vld [vmem:[#allocation4 + $0x68] sm:$0xff]   ;;  %v1918_v40 = vld [vmem:[#allocation2 + $0x1] ss:$0 sm:$0xff] }
 0x63e   :  { %v761_v9 = vpop.permute.xlu1 %760  ;;  %2242 = vmatprep.mubr.msk.bf16.mxu1 %vm2587_vm0, %v2586_v1 }
 0x63f   :  { %v767_v42 = vadd.f32 %v761_v9, %v2988_v11  ;;  %v772_v46 = vadd.f32 %v766_v8, %v2852_v47  ;;  %v2461_v47 = vld [vmem:[%s3290_s4 + $0x78] sm:$0xff]  }
 0x640   :  { %2261 = vmatpush3.bf16.msra.mxu0 %v2461_v47 }
 0x641   :  { %v773_v48 = vadd.f32 %v767_v42, %v2857_v49  ;;  %2284 = vmatprep.subr.bf16.mxu0 %v2586_v1  ;;  %v1893_v49 = vld [vmem:[%s3295_s9] ss:$0 sm:$0xff] }
 0x643   :  { %v776_v52 = vpack.c.bf16 %v773_v48, %v772_v46 }
 0x645   :  { %2243 = vmatmul.mubr.bf16.gmra.mrb[36].mxu1 %v776_v52 }
 0x646   :  { %2280 = vmatprep.mubr.msk.bf16.mxu1 %vm2587_vm0, %v2586_v1 }
 0x708   :  { %v882_v53 = vpop.f32.mrb[28].mxu1 }
 0x709   :  { %v3041_v54 = vadd.f32 %v1893_v49, %v882_v53  ;;  %v2236_v58 = vpop.f32.mrb[29].mxu1 }
 0x70a   :  { %v885_v59 = vpop.f32.mrb[30].mxu1 }
 0x70b   :  { %v905_v60 = vmax.f32 %v3041_v54, 0.0  ;;  %v3044_v62 = vadd.f32 %v1893_v49, %v885_v59  ;;  %v2237_v63 = vpop.f32.mrb[31].mxu1 }
 0x70d   :  { %v906_v0 = vmax.f32 %v3044_v62, 0.0  ;;  %v911_v2 = vadd.f32 %v905_v60, %v2966_v41 }
 0x70f   :  { %v912_v3 = vadd.f32 %v906_v0, %v2969_v50 }
 0x710   :  { %v890_v6 = vpop.f32.mrb[32].mxu1 }
 0x711   :  { %v917_v7 = vpack.c.bf16 %v912_v3, %v911_v2  ;;  %v3053_v10 = vadd.f32 %v1893_v49, %v890_v6  ;;  %v2240_v12 = vpop.f32.mrb[33].mxu1 }
 0x712   :  { %v893_v14 = vpop.f32.mrb[34].mxu1 }
 0x713   :  { %v907_v15 = vmax.f32 %v3053_v10, 0.0  ;;  %v3056_v17 = vadd.f32 %v1893_v49, %v893_v14  ;;  %v2241_v18 = vpop.f32.mrb[35].mxu1  ;;  %2263 = vmatmul.mubr.bf16.vlgmr.msra.gmra.mrb[28].mxu0 %v917_v7 }
 0x714   :  { %2266 = vmatprep.mubr.msk.bf16.mxu0 %vm2587_vm0, %v2586_v1  ;;  %2285 = vmatpush3.bf16.msra.mxu0 %v2462_v32 }
 0x715   :  { %v908_v41 = vmax.f32 %v3056_v17, 0.0  ;;  %v913_v50 = vadd.f32 %v907_v15, %v2972_v57  ;;  %2286 = vmatprep.subr.bf16.mxu0 %v2586_v1  ;;  %v2483_v17 = vld [vmem:[%s3290_s4 + $0xa8] sm:$0xff]  }
 0x717   :  { %v914_v19 = vadd.f32 %v908_v41, %v2975_v61 }
 0x718   :  { %v898_v20 = vpop.f32.mrb[36].mxu1  ;;  %2287 = vmatpush3.bf16.msra.mxu0 %v2463_v33 }
 0x719   :  { %v3067_v21 = vadd.f32 %v1893_v49, %v898_v20  ;;  %v2244_v22 = vpop.f32.mrb[37].mxu1  ;;  %v918_v23 = vpack.c.bf16 %v914_v19, %v913_v50  ;;  %2288 = vmatprep.subr.bf16.mxu0 %v2586_v1 }
 0x71a   :  { %v901_v24 = vpop.f32.mrb[38].mxu1 }
 0x71b   :  { %v909_v25 = vmax.f32 %v3067_v21, 0.0  ;;  %v3070_v28 = vadd.f32 %v1893_v49, %v901_v24  ;;  %v2245_v29 = vpop.f32.mrb[39].mxu1  ;;  %2267 = vmatmul.mubr.bf16.gmra.mrb[32].mxu0 %v918_v23  ;;  %v2485_v21 = vld [vmem:[%s3290_s4 + $0xb8] sm:$0xff]  }
 0x71c   :  { %2270 = vmatprep.mubr.msk.bf16.mxu0 %vm2587_vm0, %v2586_v1  ;;  %2289 = vmatpush3.bf16.msra.mxu0 %v2464_v34  ;;  %v2468_v34 = vld [vmem:[#allocation4 + $0x70] sm:$0xff]  }
 0x71d   :  { %v910_v57 = vmax.f32 %v3070_v28, 0.0  ;;  %v915_v61 = vadd.f32 %v909_v25, %v2985_v4  ;;  %v2465_v4 = vld [vmem:[#allocation4 + $0x58] sm:$0xff]   ;;  %2290 = vmatprep.subr.bf16.mxu0 %v2586_v1 }
 0x71f   :  { %v916_v30 = vadd.f32 %v910_v57, %v2988_v11  ;;  %v2466_v11 = vld [vmem:[#allocation4 + $0x60] sm:$0xff]  }
 0x720   :  { %2291 = vmatpush3.bf16.msra.mxu0 %v2465_v4  ;;  %v2469_v4 = vld [vmem:[#allocation4 + $0x78] sm:$0xff]  }
 0x721   :  { %v919_v31 = vpack.c.bf16 %v916_v30, %v915_v61  ;;  %2292 = vmatprep.subr.bf16.mxu0 %v2586_v1 }
 0x723   :  { %2271 = vmatmul.mubr.bf16.gmra.mrb[36].mxu0 %v919_v31 }
 0x724   :  { %2300 = vmatprep.mubr.msk.bf16.mxu0 %vm2587_vm0, %v2586_v1  ;;  %2293 = vmatpush3.bf16.msra.mxu0 %v2466_v11 }
 0x725   :  { %2294 = vmatprep.subr.bf16.mxu0 %v2586_v1 }
 0x728   :  { %2295 = vmatpush3.bf16.msra.mxu0 %v2467_v38  ;;  %v1066_v38 = vpop.permute.xlu0 %1065 }
 0x729   :  { %2296 = vmatprep.subr.bf16.mxu0 %v2586_v1 }
 0x72c   :  { %2297 = vmatpush3.bf16.msra.mxu0 %v2468_v34 }
 0x72d   :  { %2298 = vmatprep.subr.bf16.mxu0 %v2586_v1 }
 0x730   :  { %2299 = vmatpush3.bf16.msra.mxu0 %v2469_v4 }
 0x731   :  { %2318 = vmatprep.subr.bf16.mxu0 %v2586_v1 }
 0x7e6   :  { %v1027_v8 = vpop.f32.mrb[28].mxu0 }
 0x7e7   :  { %v1028_v9 = vadd.f32 %v1918_v40, %v1027_v8  ;;  %v2264_v42 = vpop.f32.mrb[29].mxu0  ;;  %v1068_v8 = vpop.permute.xlu1 %1067 }
 0x7e8   :  { %v1030_v46 = vpop.f32.mrb[30].mxu0 }
 0x7e9   :  { %v1050_v48 = vmax.f32 %v1028_v9, 0.0  ;;  %v1031_v52 = vadd.f32 %v1918_v40, %v1030_v46  ;;  %v2265_v36 = vpop.f32.mrb[31].mxu0 }
 0x7ea   :  { %v1928_v36 = vld [vmem:[#allocation6 + $0x1] ss:$0 sm:$0xff] }
 0x7eb   :  { %v1051_v39 = vmax.f32 %v1031_v52, 0.0  ;;  %v1056_v47 = vmul.f32 %v1050_v48, %v2871_v5 }
 0x7ed   :  { %v1057_v49 = vmul.f32 %v1051_v39, %v2873_v13 }
 0x7ee   :  { %v1035_v53 = vpop.f32.mrb[32].mxu0 }
 0x7ef   :  { %v1062_v58 = vpack.c.bf16 %v1057_v49, %v1056_v47  ;;  %v1036_v59 = vadd.f32 %v1918_v40, %v1035_v53  ;;  %v2268_v63 = vpop.f32.mrb[33].mxu0 }
 0x7f0   :  { %v1038_v2 = vpop.f32.mrb[34].mxu0 }
 0x7f1   :  { %v1052_v3 = vmax.f32 %v1036_v59, 0.0  ;;  %v1039_v6 = vadd.f32 %v1918_v40, %v1038_v2  ;;  %v2269_v7 = vpop.f32.mrb[35].mxu0  ;;  %2275 = vmatpush3.bf16.msra.mxu1 %v1062_v58 }
 0x7f2   :  { %2276 = vmatprep.subr.bf16.mxu1 %v2586_v1 }
 0x7f3   :  { %v1053_v12 = vmax.f32 %v1039_v6, 0.0  ;;  %v1058_v14 = vmul.f32 %v1052_v3, %v2877_v16 }
 0x7f5   :  { %v1059_v18 = vmul.f32 %v1053_v12, %v2880_v27 }
 0x7f6   :  { %v1043_v50 = vpop.f32.mrb[36].mxu0 }
 0x7f7   :  { %v1063_v19 = vpack.c.bf16 %v1059_v18, %v1058_v14  ;;  %v1044_v20 = vadd.f32 %v1918_v40, %v1043_v50  ;;  %v2272_v22 = vpop.f32.mrb[37].mxu0 }
 0x7f8   :  { %v1046_v23 = vpop.f32.mrb[38].mxu0 }
 0x7f9   :  { %v1054_v24 = vmax.f32 %v1044_v20, 0.0  ;;  %v1047_v29 = vadd.f32 %v1918_v40, %v1046_v23  ;;  %v2273_v61 = vpop.f32.mrb[39].mxu0  ;;  %2277 = vmatpush3.bf16.msra.mxu1 %v1063_v19 }
 0x7fa   :  { %2278 = vmatprep.subr.bf16.mxu1 %v2586_v1 }
 0x7fb   :  { %v1055_v30 = vmax.f32 %v1047_v29, 0.0  ;;  %v1060_v31 = vmul.f32 %v1054_v24, %v2885_v43  ;;  %v2476_v24 = vld [vmem:[%s3294_s8 + $0x70] sm:$0xff]   ;;  %v2477_v29 = vld [vmem:[%s3294_s8 + $0x78] sm:$0xff]  }
 0x7fd   :  { %v1061_v32 = vmul.f32 %v1055_v30, %v2887_v45 }
 0x7ff   :  { %v1064_v33 = vpack.c.bf16 %v1061_v32, %v1060_v31 }
 0x801   :  { %2279 = vmatpush3.bf16.msra.mxu1 %v1064_v33 }
 0x802   :  { %2304 = vmatprep.subr.bf16.mxu1 %v2586_v1 }
 0x804   :  { %2281 = vmatmul.mubr.msk.bf16.vlgmr.msra.gmra.mrb[40].mxu1 %vm454_vm14, %v2891_v51 }
 0x805   :  { %2306 = vmatprep.mubr.msk.bf16.mxu1 %vm2587_vm0, %v2586_v1 }
 0x8d7   :  { %v1103_v11 = vpop.f32.mrb[40].mxu1 }
 0x8d8   :  { %v2282_v40 = vpop.f32.mrb[41].mxu1  ;;  %v1104_v42 = vadd.f32 %v1103_v11, %v1066_v38 }
 0x8d9   :  { %v1106_v9 = vpop.f32.mrb[42].mxu1 }
 0x8da   :  { %v1107_v46 = vadd.f32 %v1106_v9, %v1068_v8  ;;  %v2283_v48 = vpop.f32.mrb[43].mxu1 }
 0x8dc   :  { %v1110_v52 = vpack.c.bf16 %v1107_v46, %v1104_v42 }
 0x8de   :  { %2301 = vmatmul.mubr.bf16.vlgmr.msra.gmra.mrb[40].mxu0 %v1110_v52 }
 0x8df   :  { %2320 = vmatprep.mubr.msk.bf16.mxu0 %vm2587_vm0, %v2586_v1 }
 0x9b1   :  { %v1218_v39 = vpop.f32.mrb[40].mxu0 }
 0x9b2   :  { %v1219_v47 = vadd.f32 %v1928_v36, %v1218_v39  ;;  %v2302_v49 = vpop.f32.mrb[41].mxu0  ;;  %v2479_v39 = vld [vmem:[%s3290_s4 + $0x88] sm:$0xff]  }
 0x9b3   :  { %v1221_v53 = vpop.f32.mrb[42].mxu0 }
 0x9b4   :  { %v1225_v58 = vmax.f32 %v1219_v47, 0.0  ;;  %v1222_v59 = vadd.f32 %v1928_v36, %v1221_v53  ;;  %v2303_v63 = vpop.f32.mrb[43].mxu0  ;;  %v2478_v36 = vld [vmem:[%s3290_s4 + $0x80] sm:$0xff]  }
 0x9b6   :  { %v1226_v2 = vmax.f32 %v1222_v59, 0.0  ;;  %v1227_v3 = vmul.f32 %v1225_v58, %v1225_v58 }
 0x9b8   :  { %1229 = vadd.xlane.f32.xlu0 %v1227_v3  ;;  %v1228_v6 = vmul.f32 %v1226_v2, %v1226_v2 }
 0x9ba   :  { %1231 = vadd.xlane.f32.xlu1 %v1228_v6 }
 0xa45   :  { %v1230_v7 = vpop.xlane.xlu0 %1229 }
 0xa46   :  { %v1233_v12 = vmax.f32 %v1230_v7, 1e-24  ;;  %v2481_v7 = vld [vmem:[%s3290_s4 + $0x98] sm:$0xff]  }
 0xa47   :  { %v1232_v14 = vpop.xlane.xlu1 %1231 }
 0xa48   :  { %2500 = vrsqrt.f32 %v1233_v12  ;;  %v1234_v18 = vmax.f32 %v1232_v14, 1e-24  ;;  %v2482_v12 = vld [vmem:[%s3290_s4 + $0xa0] sm:$0xff]  }
 0xa4a   :  { %2502 = vrsqrt.f32 %v1234_v18 }
 0xa52   :  { %v2501_v50 = vpop.eup %2500 }
 0xa53   :  { %v3106_v20 = vmul.f32 %v2501_v50, %v1225_v58 }
 0xa54   :  { %v2503_v19 = vpop.eup %2502 }
 0xa55   :  { %v3108_v22 = vmul.f32 %v2503_v19, %v1226_v2  ;;  %v2480_v2 = vld [vmem:[%s3290_s4 + $0x90] sm:$0xff]  }
 0xa57   :  { %v1239_v23 = vpack.c.bf16 %v3108_v22, %v3106_v20 }
 0xa59   :  { %2305 = vmatpush3.bf16.msra.mxu1 %v1239_v23  ;;  %2319 = vmatpush3.bf16.msra.mxu0 %v1239_v23 }
 0xa5a   :  { %2332 = vmatprep.subr.bf16.mxu1 %v2586_v1  ;;  %2360 = vmatprep.subr.bf16.mxu0 %v2586_v1 }
 0xa5c   :  { %2307 = vmatmul.mubr.msk.bf16.vlgmr.msra.gmra.mrb[44].mxu1 %vm169_vm3, %v2742_v26  ;;  %2321 = vmatmul.mubr.msk.bf16.vlgmr.msra.gmra.mrb[44].mxu0 %vm169_vm3, %v2755_v37  ;;  %v2470_v26 = vld [vmem:[%s3294_s8 + $0x40] sm:$0xff]   ;;  %v2472_v37 = vld [vmem:[%s3294_s8 + $0x50] sm:$0xff]  }
 0xa5d   :  { %2310 = vmatprep.mubr.msk.bf16.mxu1 %vm2587_vm0, %v2586_v1  ;;  %2324 = vmatprep.mubr.msk.bf16.mxu0 %vm2587_vm0, %v2586_v1 }
 0xa5e   :  { %2333 = vmatpush3.bf16.msra.mxu1 %v2470_v26  ;;  %2361 = vmatpush3.bf16.msra.mxu0 %v2478_v36 }
 0xa5f   :  { %2334 = vmatprep.subr.bf16.mxu1 %v2586_v1  ;;  %2362 = vmatprep.subr.bf16.mxu0 %v2586_v1 }
 0xa62   :  { %2363 = vmatpush3.bf16.msra.mxu0 %v2479_v39 }
 0xa63   :  { %2364 = vmatprep.subr.bf16.mxu0 %v2586_v1 }
 0xa64   :  { %2311 = vmatmul.mubr.msk.bf16.gmra.mrb[48].mxu1 %vm169_vm3, %v2752_v35  ;;  %2325 = vmatmul.mubr.msk.bf16.gmra.mrb[48].mxu0 %vm169_vm3, %v2764_v44  ;;  %v2471_v35 = vld [vmem:[%s3294_s8 + $0x48] sm:$0xff]   ;;  %v2473_v44 = vld [vmem:[%s3294_s8 + $0x58] sm:$0xff]  }
 0xa65   :  { %2314 = vmatprep.mubr.msk.bf16.mxu1 %vm2587_vm0, %v2586_v1  ;;  %2328 = vmatprep.mubr.msk.bf16.mxu0 %vm2587_vm0, %v2586_v1 }
 0xa66   :  { %2335 = vmatpush3.bf16.msra.mxu1 %v2471_v35  ;;  %2365 = vmatpush3.bf16.msra.mxu0 %v2480_v2 }
 0xa67   :  { %2336 = vmatprep.subr.bf16.mxu1 %v2586_v1  ;;  %2366 = vmatprep.subr.bf16.mxu0 %v2586_v1 }
 0xa6a   :  { %2337 = vmatpush3.bf16.msra.mxu1 %v2472_v37  ;;  %2367 = vmatpush3.bf16.msra.mxu0 %v2481_v7 }
 0xa6b   :  { %2338 = vmatprep.subr.bf16.mxu1 %v2586_v1  ;;  %2368 = vmatprep.subr.bf16.mxu0 %v2586_v1 }
 0xa6c   :  { %2315 = vmatmul.mubr.msk.bf16.gmra.mrb[52].mxu1 %vm169_vm3, %v2772_v55  ;;  %2329 = vmatmul.mubr.msk.bf16.gmra.mrb[52].mxu0 %vm169_vm3, %v2774_v56  ;;  %v2474_v55 = vld [vmem:[%s3294_s8 + $0x60] sm:$0xff]   ;;  %v2475_v56 = vld [vmem:[%s3294_s8 + $0x68] sm:$0xff]  }
 0xa6d   :  { %2348 = vmatprep.mubr.msk.bf16.mxu1 %vm2587_vm0, %v2586_v1  ;;  %2376 = vmatprep.mubr.msk.bf16.mxu0 %vm2587_vm0, %v2586_v1 }
 0xa6e   :  { %2339 = vmatpush3.bf16.msra.mxu1 %v2473_v44  ;;  %2369 = vmatpush3.bf16.msra.mxu0 %v2482_v12 }
 0xa6f   :  { %2340 = vmatprep.subr.bf16.mxu1 %v2586_v1  ;;  %2370 = vmatprep.subr.bf16.mxu0 %v2586_v1 }
 0xa72   :  { %2341 = vmatpush3.bf16.msra.mxu1 %v2474_v55  ;;  %2371 = vmatpush3.bf16.msra.mxu0 %v2483_v17 }
 0xa73   :  { %2342 = vmatprep.subr.bf16.mxu1 %v2586_v1  ;;  %2372 = vmatprep.subr.bf16.mxu0 %v2586_v1 }
 0xa76   :  { %2343 = vmatpush3.bf16.msra.mxu1 %v2475_v56 }
 0xa77   :  { %2344 = vmatprep.subr.bf16.mxu1 %v2586_v1 }
 0xa7a   :  { %2345 = vmatpush3.bf16.msra.mxu1 %v2476_v24 }
 0xa7b   :  { %2346 = vmatprep.subr.bf16.mxu1 %v2586_v1 }
 0xa7e   :  { %2347 = vmatpush3.bf16.msra.mxu1 %v2477_v29 }
 0xa7f   :  { %2388 = vmatprep.subr.bf16.mxu1 %v2586_v1 }
 0xb2f   :  { %v3170_v61 = vpop.f32.mrb[44].mxu1  ;;  %v1331_v30 = vpop.f32.mrb[44].mxu0 }
 0xb30   :  { %1354 = vrot.lane.b32.xlu0 %v1331_v30, %s2579_s23  ;;  %v2308_v31 = vpop.f32.mrb[45].mxu1  ;;  %v2322_v32 = vpop.f32.mrb[45].mxu0 }
 0xb31   :  { %v3173_v33 = vpop.f32.mrb[46].mxu1  ;;  %v1334_v34 = vpop.f32.mrb[46].mxu0 }
 0xb32   :  { %1356 = vrot.lane.b32.xlu1 %v1334_v34, %s2579_s23  ;;  %v2309_v4 = vpop.f32.mrb[47].mxu1  ;;  %v2323_v11 = vpop.f32.mrb[47].mxu0 }
 0xb37   :  { %v3176_v38 = vpop.f32.mrb[48].mxu1  ;;  %v1339_v40 = vpop.f32.mrb[48].mxu0 }
 0xb38   :  { %1358 = vrot.lane.b32.xlu0 %v1339_v40, %s2579_s23  ;;  %v2312_v8 = vpop.f32.mrb[49].mxu1  ;;  %v2326_v9 = vpop.f32.mrb[49].mxu0 }
 0xb39   :  { %v3179_v42 = vpop.f32.mrb[50].mxu1  ;;  %v1342_v46 = vpop.f32.mrb[50].mxu0 }
 0xb3a   :  { %1360 = vrot.lane.b32.xlu1 %v1342_v46, %s2579_s23  ;;  %v2313_v48 = vpop.f32.mrb[51].mxu1  ;;  %v2327_v52 = vpop.f32.mrb[51].mxu0 }
 0xb3f   :  { %v3189_v47 = vpop.f32.mrb[52].mxu1  ;;  %v1347_v49 = vpop.f32.mrb[52].mxu0 }
 0xb40   :  { %1362 = vrot.lane.b32.xlu0 %v1347_v49, %s2579_s23  ;;  %v2316_v53 = vpop.f32.mrb[53].mxu1  ;;  %v2330_v58 = vpop.f32.mrb[53].mxu0 }
 0xb41   :  { %v3192_v59 = vpop.f32.mrb[54].mxu1  ;;  %v1350_v63 = vpop.f32.mrb[54].mxu0 }
 0xb42   :  { %1364 = vrot.lane.b32.xlu1 %v1350_v63, %s2579_s23  ;;  %v2317_v3 = vpop.f32.mrb[55].mxu1  ;;  %v2331_v6 = vpop.f32.mrb[55].mxu0 }
 0xb44   :  { %1671 = vrot.lane.b32.xlu0 %v3106_v20, %s2579_s23 }
 0xb46   :  { %1673 = vrot.lane.b32.xlu1 %v3108_v22, %s2579_s23 }
 0xba2   :  { %v1355_v14 = vpop.permute.xlu0 %1354 }
 0xba3   :  { %v1366_v18 = vadd.f32 %v1355_v14, %v3170_v61 }
 0xba4   :  { %v1357_v50 = vpop.permute.xlu1 %1356 }
 0xba5   :  { %v1367_v19 = vadd.f32 %v1357_v50, %v3173_v33  ;;  %v1372_v20 = vadd.f32 %v1366_v18, %v905_v60 }
 0xba7   :  { %v1373_v22 = vadd.f32 %v1367_v19, %v906_v0 }
 0xba9   :  { %v1378_v23 = vpack.c.bf16 %v1373_v22, %v1372_v20  ;;  %v2487_v22 = vld [vmem:[#allocation4 + $0x88] sm:$0xff]  }
 0xbaa   :  { %v1359_v26 = vpop.permute.xlu0 %1358 }
 0xbab   :  { %v1368_v35 = vadd.f32 %v1359_v26, %v3176_v38  ;;  %2349 = vmatmul.mubr.bf16.vlgmr.msra.gmra.mrb[56].mxu1 %v1378_v23  ;;  %v2488_v23 = vld [vmem:[#allocation4 + $0x90] sm:$0xff]   ;;  %v2489_v26 = vld [vmem:[#allocation4 + $0x98] sm:$0xff]  }
 0xbac   :  { %v1361_v37 = vpop.permute.xlu1 %1360  ;;  %2352 = vmatprep.mubr.msk.bf16.mxu1 %vm2587_vm0, %v2586_v1 }
 0xbad   :  { %v1369_v44 = vadd.f32 %v1361_v37, %v3179_v42  ;;  %v1374_v55 = vadd.f32 %v1368_v35, %v907_v15  ;;  %v1985_v35 = vld [vmem:[#allocation2 + $0x2] ss:$0 sm:$0xff] }
 0xbaf   :  { %v1375_v54 = vadd.f32 %v1369_v44, %v908_v41  ;;  %v2484_v41 = vld [vmem:[%s3290_s4 + $0xb0] sm:$0xff]  }
 0xbb0   :  { %2373 = vmatpush3.bf16.msra.mxu0 %v2484_v41 }
 0xbb1   :  { %v1379_v60 = vpack.c.bf16 %v1375_v54, %v1374_v55  ;;  %2374 = vmatprep.subr.bf16.mxu0 %v2586_v1 }
 0xbb2   :  { %v1363_v62 = vpop.permute.xlu0 %1362 }
 0xbb3   :  { %v1370_v0 = vadd.f32 %v1363_v62, %v3189_v47  ;;  %2353 = vmatmul.mubr.bf16.gmra.mrb[60].mxu1 %v1379_v60 }
 0xbb4   :  { %v1365_v56 = vpop.permute.xlu1 %1364  ;;  %2356 = vmatprep.mubr.msk.bf16.mxu1 %vm2587_vm0, %v2586_v1  ;;  %2375 = vmatpush3.bf16.msra.mxu0 %v2485_v21 }
 0xbb5   :  { %v1371_v24 = vadd.f32 %v1365_v56, %v3192_v59  ;;  %v1376_v29 = vadd.f32 %v1370_v0, %v909_v25  ;;  %2398 = vmatprep.subr.bf16.mxu0 %v2586_v1  ;;  %v1960_v25 = vld [vmem:[%s3295_s9 + $0x1] ss:$0 sm:$0xff] }
 0xbb7   :  { %v1377_v10 = vadd.f32 %v1371_v24, %v910_v57 }
 0xbb9   :  { %v1380_v15 = vpack.c.bf16 %v1377_v10, %v1376_v29 }
 0xbbb   :  { %2357 = vmatmul.mubr.bf16.gmra.mrb[64].mxu1 %v1380_v15 }
 0xbbc   :  { %2394 = vmatprep.mubr.msk.bf16.mxu1 %vm2587_vm0, %v2586_v1 }
 0xc7e   :  { %v1488_v28 = vpop.f32.mrb[56].mxu1 }
 0xc7f   :  { %v1489_v57 = vadd.f32 %v1960_v25, %v1488_v28  ;;  %v2350_v30 = vpop.f32.mrb[57].mxu1 }
 0xc80   :  { %v1491_v31 = vpop.f32.mrb[58].mxu1 }
 0xc81   :  { %v1511_v32 = vmax.f32 %v1489_v57, 0.0  ;;  %v1492_v34 = vadd.f32 %v1960_v25, %v1491_v31  ;;  %v2351_v4 = vpop.f32.mrb[59].mxu1 }
 0xc83   :  { %v1517_v11 = vadd.f32 %v1511_v32, %v3170_v61  ;;  %v1512_v40 = vmax.f32 %v1492_v34, 0.0 }
 0xc85   :  { %v1518_v8 = vadd.f32 %v1512_v40, %v3173_v33 }
 0xc86   :  { %v1496_v9 = vpop.f32.mrb[60].mxu1 }
 0xc87   :  { %v1523_v46 = vpack.c.bf16 %v1518_v8, %v1517_v11  ;;  %v1497_v48 = vadd.f32 %v1960_v25, %v1496_v9  ;;  %v2354_v52 = vpop.f32.mrb[61].mxu1 }
 0xc88   :  { %v1499_v36 = vpop.f32.mrb[62].mxu1 }
 0xc89   :  { %v1513_v39 = vmax.f32 %v1497_v48, 0.0  ;;  %v1500_v49 = vadd.f32 %v1960_v25, %v1499_v36  ;;  %v2355_v53 = vpop.f32.mrb[63].mxu1  ;;  %2377 = vmatmul.mubr.bf16.vlgmr.msra.gmra.mrb[56].mxu0 %v1523_v46 }
 0xc8a   :  { %2380 = vmatprep.mubr.msk.bf16.mxu0 %vm2587_vm0, %v2586_v1 }
 0xc8b   :  { %v1519_v58 = vadd.f32 %v1513_v39, %v3176_v38  ;;  %v1514_v63 = vmax.f32 %v1500_v49, 0.0  ;;  %v1672_v49 = vpop.permute.xlu0 %1671 }
 0xc8d   :  { %v1520_v61 = vadd.f32 %v1514_v63, %v3179_v42  ;;  %v2486_v42 = vld [vmem:[#allocation4 + $0x80] sm:$0xff]  }
 0xc8e   :  { %v1504_v2 = vpop.f32.mrb[64].mxu1  ;;  %2399 = vmatpush3.bf16.msra.mxu0 %v2486_v42 }
 0xc8f   :  { %v1505_v3 = vadd.f32 %v1960_v25, %v1504_v2  ;;  %v2358_v33 = vpop.f32.mrb[65].mxu1  ;;  %v1524_v6 = vpack.c.bf16 %v1520_v61, %v1519_v58  ;;  %2400 = vmatprep.subr.bf16.mxu0 %v2586_v1  ;;  %v1674_v58 = vpop.permute.xlu1 %1673 }
 0xc90   :  { %v1507_v7 = vpop.f32.mrb[66].mxu1 }
 0xc91   :  { %v1515_v12 = vmax.f32 %v1505_v3, 0.0  ;;  %v1508_v14 = vadd.f32 %v1960_v25, %v1507_v7  ;;  %v2359_v18 = vpop.f32.mrb[67].mxu1  ;;  %2381 = vmatmul.mubr.bf16.gmra.mrb[60].mxu0 %v1524_v6  ;;  %v1995_v3 = vld [vmem:[#allocation6 + $0x2] ss:$0 sm:$0xff] }
 0xc92   :  { %2384 = vmatprep.mubr.msk.bf16.mxu0 %vm2587_vm0, %v2586_v1  ;;  %2401 = vmatpush3.bf16.msra.mxu0 %v2487_v22 }
 0xc93   :  { %v1521_v50 = vadd.f32 %v1515_v12, %v3189_v47  ;;  %v1516_v19 = vmax.f32 %v1508_v14, 0.0  ;;  %2402 = vmatprep.subr.bf16.mxu0 %v2586_v1  ;;  %v2490_v47 = vld [vmem:[#allocation4 + $0xa0] sm:$0xff]  }
 0xc95   :  { %v1522_v38 = vadd.f32 %v1516_v19, %v3192_v59  ;;  %v2491_v59 = vld [vmem:[#allocation4 + $0xa8] sm:$0xff]  }
 0xc96   :  { %2403 = vmatpush3.bf16.msra.mxu0 %v2488_v23 }
 0xc97   :  { %v1525_v20 = vpack.c.bf16 %v1522_v38, %v1521_v50  ;;  %2404 = vmatprep.subr.bf16.mxu0 %v2586_v1 }
 0xc99   :  { %2385 = vmatmul.mubr.bf16.gmra.mrb[64].mxu0 %v1525_v20 }
 0xc9a   :  { %2414 = vmatprep.mubr.msk.bf16.mxu0 %vm2587_vm0, %v2586_v1  ;;  %2405 = vmatpush3.bf16.msra.mxu0 %v2489_v26 }
 0xc9b   :  { %2406 = vmatprep.subr.bf16.mxu0 %v2586_v1 }
 0xc9e   :  { %2407 = vmatpush3.bf16.msra.mxu0 %v2490_v47 }
 0xc9f   :  { %2408 = vmatprep.subr.bf16.mxu0 %v2586_v1 }
 0xca2   :  { %2409 = vmatpush3.bf16.msra.mxu0 %v2491_v59 }
 0xca3   :  { %2410 = vmatprep.subr.bf16.mxu0 %v2586_v1 }
 0xd5c   :  { %v1633_v37 = vpop.f32.mrb[56].mxu0 }
 0xd5d   :  { %v1634_v44 = vadd.f32 %v1985_v35, %v1633_v37  ;;  %v2378_v55 = vpop.f32.mrb[57].mxu0 }
 0xd5e   :  { %v1636_v54 = vpop.f32.mrb[58].mxu0 }
 0xd5f   :  { %v1656_v60 = vmax.f32 %v1634_v44, 0.0  ;;  %v1637_v62 = vadd.f32 %v1985_v35, %v1636_v54  ;;  %v2379_v0 = vpop.f32.mrb[59].mxu0 }
 0xd61   :  { %v1657_v56 = vmax.f32 %v1637_v62, 0.0  ;;  %v1662_v24 = vmul.f32 %v1656_v60, %v2871_v5 }
 0xd63   :  { %v1663_v29 = vmul.f32 %v1657_v56, %v2873_v13 }
 0xd64   :  { %v1641_v10 = vpop.f32.mrb[60].mxu0 }
 0xd65   :  { %v1668_v15 = vpack.c.bf16 %v1663_v29, %v1662_v24  ;;  %v1642_v17 = vadd.f32 %v1985_v35, %v1641_v10  ;;  %v2382_v41 = vpop.f32.mrb[61].mxu0 }
 0xd66   :  { %v1644_v21 = vpop.f32.mrb[62].mxu0 }
 0xd67   :  { %v1658_v25 = vmax.f32 %v1642_v17, 0.0  ;;  %v1645_v28 = vadd.f32 %v1985_v35, %v1644_v21  ;;  %v2383_v57 = vpop.f32.mrb[63].mxu0  ;;  %2389 = vmatpush3.bf16.msra.mxu1 %v1668_v15 }
 0xd68   :  { %2390 = vmatprep.subr.bf16.mxu1 %v2586_v1 }
 0xd69   :  { %v1659_v30 = vmax.f32 %v1645_v28, 0.0  ;;  %v1664_v31 = vmul.f32 %v1658_v25, %v2877_v16  ;;  %v2492_v16 = vld [vmem:[#allocation4 + $0xb0] sm:$0xff]  }
 0xd6a   :  { %2411 = vmatpush3.bf16.msra.mxu0 %v2492_v16 }
 0xd6b   :  { %v1665_v32 = vmul.f32 %v1659_v30, %v2880_v27  ;;  %2412 = vmatprep.subr.bf16.mxu0 %v2586_v1  ;;  %v2493_v27 = vld [vmem:[#allocation4 + $0xb8] sm:$0xff]  }
 0xd6c   :  { %v1649_v34 = vpop.f32.mrb[64].mxu0 }
 0xd6d   :  { %v1669_v5 = vpack.c.bf16 %v1665_v32, %v1664_v31  ;;  %v1650_v4 = vadd.f32 %v1985_v35, %v1649_v34  ;;  %v2386_v13 = vpop.f32.mrb[65].mxu0 }
 0xd6e   :  { %v1652_v11 = vpop.f32.mrb[66].mxu0  ;;  %2413 = vmatpush3.bf16.msra.mxu0 %v2493_v27 }
 0xd6f   :  { %v1660_v40 = vmax.f32 %v1650_v4, 0.0  ;;  %v1653_v8 = vadd.f32 %v1985_v35, %v1652_v11  ;;  %v2387_v9 = vpop.f32.mrb[67].mxu0  ;;  %2391 = vmatpush3.bf16.msra.mxu1 %v1669_v5 }
 0xd70   :  { %2392 = vmatprep.subr.bf16.mxu1 %v2586_v1 }
 0xd71   :  { %v1661_v46 = vmax.f32 %v1653_v8, 0.0  ;;  %v1666_v48 = vmul.f32 %v1660_v40, %v2885_v43 }
 0xd73   :  { %v1667_v52 = vmul.f32 %v1661_v46, %v2887_v45 }
 0xd75   :  { %v1670_v36 = vpack.c.bf16 %v1667_v52, %v1666_v48 }
 0xd77   :  { %2393 = vmatpush3.bf16.msra.mxu1 %v1670_v36 }
 0xd7a   :  { %2395 = vmatmul.mubr.msk.bf16.vlgmr.msra.gmra.mrb[68].mxu1 %vm454_vm14, %v2891_v51 }
 0xe4d   :  { %v1709_v39 = vpop.f32.mrb[68].mxu1 }
 0xe4e   :  { %v2396_v53 = vpop.f32.mrb[69].mxu1  ;;  %v1710_v61 = vadd.f32 %v1709_v39, %v1672_v49 }
 0xe4f   :  { %v1712_v63 = vpop.f32.mrb[70].mxu1 }
 0xe50   :  { %v1713_v43 = vadd.f32 %v1712_v63, %v1674_v58  ;;  %v2397_v2 = vpop.f32.mrb[71].mxu1 }
 0xe52   :  { %v1716_v45 = vpack.c.bf16 %v1713_v43, %v1710_v61 }
 0xe54   :  { %2415 = vmatmul.mubr.bf16.vlgmr.msra.gmra.mrb[68].mxu0 %v1716_v45 }
 0xf27   :  { %v1824_v33 = vpop.f32.mrb[68].mxu0 }
 0xf28   :  { %v1825_v6 = vadd.f32 %v1995_v3, %v1824_v33  ;;  %v2416_v51 = vpop.f32.mrb[69].mxu0 }
 0xf29   :  { %v1827_v7 = vpop.f32.mrb[70].mxu0 }
 0xf2a   :  { %v1831_v12 = vmax.f32 %v1825_v6, 0.0  ;;  %v1828_v14 = vadd.f32 %v1995_v3, %v1827_v7  ;;  %v2417_v1 = vpop.f32.mrb[71].mxu0 }
 0xf2c   :  { %v1832_v18 = vmax.f32 %v1828_v14, 0.0  ;;  %v1833_v50 = vmul.f32 %v1831_v12, %v1831_v12 }
 0xf2e   :  { %1835 = vadd.xlane.f32.xlu0 %v1833_v50  ;;  %v1834_v19 = vmul.f32 %v1832_v18, %v1832_v18 }
 0xf30   :  { %1837 = vadd.xlane.f32.xlu1 %v1834_v19 }
 0xfbb   :  { %v1836_v38 = vpop.xlane.xlu0 %1835 }
 0xfbc   :  { %v1839_v20 = vmax.f32 %v1836_v38, 1e-24 }
 0xfbd   :  { %v1838_v42 = vpop.xlane.xlu1 %1837 }
 0xfbe   :  { %2504 = vrsqrt.f32 %v1839_v20  ;;  %v1840_v22 = vmax.f32 %v1838_v42, 1e-24 }
 0xfc0   :  { %2506 = vrsqrt.f32 %v1840_v22 }
 0xfc8   :  { %v2505_v23 = vpop.eup %2504 }
 0xfc9   :  { %v1843_v26 = vmul.f32 %v2505_v23, %v1831_v12 }
 0xfca   :  { %v2507_v47 = vpop.eup %2506 }
 0xfcb   :  { %1845 = vst [vmem:[%s3296_s10] sm:$0xff] %v1843_v26  ;;  %v1844_v59 = vmul.f32 %v2507_v47, %v1832_v18 }
 0xfcd   :  { %1846 = vst [vmem:[%s3296_s10 + $0x8] sm:$0xff] %v1844_v59 }
 0xfce   :  { %1851 = vsyncpa [#allocation3], 1 }
 0xfcf   :  { %1852 = vsyncpa [#allocation5], 1 }

</bundles_post_ra>
